<compile_context>
chip_gen: v6e
topology: v6e:2x2x1
jax: 0.10.0
libtpu: 0.0.40
codegen_flags: <defaults>
</compile_context>

<pallas_src>
import functools
import math

import jax
import jax.numpy as jnp
import numpy as np
from jax import lax
from jax.experimental import pallas as pl
from jax.experimental.pallas import tpu as pltpu

LANE = 128      # packed gate block width / hidden-state lane width
SLOT = 32       # per-gate slot inside the packed block
OFF_N, OFF_Z, OFF_R, OFF_Z2 = 0, 32, 64, 96   # gate column offsets [n|z|r|z]


def _round_up(x, m):
    return ((x + m - 1) // m) * m


# ---------------------------------------------------------------------------
# Fused multi-layer GRU kernel (wavefront over time x layers).
#   x_ref   : (N, Bt, Hx)   f32  time-major input, feature dim zero-padded
#   wi_ref  : (L, Hx, 128)  bf16 input weights, packed gate columns [n|z|r|z]
#   wh_ref  : (L, 128, 128) bf16 hidden weights, same packing (rows 0:H used)
#   bi_ref  : (L, 1, 128)   f32  b_ih (+ b_hh folded in for the r / z slots)
#   bhn_ref : (L, 1, 128)   f32  b_hh for the n gate (lanes 0:H), must stay
#                                inside r * (gh_n + b_hh_n)
#   out_ref : (N, Bt, 128)  f32  last layer's hidden states (lanes 0:H valid)
# ---------------------------------------------------------------------------
def _gru_stack_kernel(x_ref, wi_ref, wh_ref, bi_ref, bhn_ref, out_ref, *,
                      n_layers):
    N, B, Hx = x_ref.shape
    Hp = out_ref.shape[-1]
    L = n_layers

    # Per-layer constants: loaded / broadcast ONCE (JAX does not CSE
    # broadcast_in_dim, so keep these out of the time loop).
    wi = [wi_ref[l] for l in range(L)]                                # bf16
    wh = [wh_ref[l] for l in range(L)]                                # bf16
    bi = [jnp.broadcast_to(bi_ref[l], (B, Hp)) for l in range(L)]     # f32
    bhn = [jnp.broadcast_to(bhn_ref[l], (B, Hp)) for l in range(L)]   # f32

    # Layer-0 input gates for every timestep in one batched MXU matmul
    # (off the recurrence critical path).
    x2d = x_ref[...].reshape(N * B, Hx).astype(jnp.bfloat16)
    gi0 = (jnp.dot(x2d, wi[0], preferred_element_type=jnp.float32)
           + jnp.broadcast_to(bi_ref[0], (N * B, Hp)))

    def gates(pre):
        # Packed block is [n | z | r | z]; after sigmoid over all 128 lanes,
        # roll by 64 puts r on lanes [0,H) and roll by 32 puts a valid z copy
        # on lanes [0,H) for either rotate-direction convention.  Lanes >= H
        # carry garbage everywhere, which is harmless: weight rows >= H are
        # zero and the wrapper slices lanes [0,H) of the output.
        s = jax.nn.sigmoid(pre)
        return pltpu.roll(s, 64, axis=1), pltpu.roll(s, 32, axis=1)   # r, z

    h = [None] * L        # f32 hidden state (vreg-carried), useful lanes [0,H)
    h_bf = [None] * L     # bf16 copy used as the next matmul LHS

    # ---- t = 0 peeled: h_prev == 0 for every layer -> no W_hh matmul and no
    #      z * h_prev term on the first step of every layer. ----
    gi = gi0[0:B]
    for l in range(L):
        if l > 0:
            gi = jnp.dot(h_bf[l - 1], wi[l],
                         preferred_element_type=jnp.float32) + bi[l]
        r, z = gates(gi)
        n = jnp.tanh(gi + r * bhn[l])
        h[l] = n - z * n                      # (1 - z) * n
        h_bf[l] = h[l].astype(jnp.bfloat16)
    out_ref[0] = h[L - 1].astype(out_ref.dtype)

    # ---- remaining timesteps, layers interleaved (wavefront).  Everything is
    #      in one basic block with register-carried h, so the scheduler sees
    #      only the true data deps and can overlap the per-layer chains. ----
    for t in range(1, N):
        gi = gi0[t * B:(t + 1) * B]
        for l in range(L):
            if l > 0:
                gi = jnp.dot(h_bf[l - 1], wi[l],
                             preferred_element_type=jnp.float32) + bi[l]
            gh = jnp.dot(h_bf[l], wh[l], preferred_element_type=jnp.float32)
            r, z = gates(gi + gh)
            n = jnp.tanh(gi + r * (gh + bhn[l]))
            h[l] = n + z * (h[l] - n)         # (1 - z) * n + z * h_prev
            h_bf[l] = h[l].astype(jnp.bfloat16)
        out_ref[t] = h[L - 1].astype(out_ref.dtype)   # lane-dense (8,128) store


def gru_decoder_stack(x_pad, wi_all, wh_all, bi_all, bhn_all, *, b_tile):
    N, B_pad, Hx = x_pad.shape
    L, _, Hp = wh_all.shape
    num_b_tiles = B_pad // b_tile
    kernel = functools.partial(_gru_stack_kernel, n_layers=L)
    return pl.pallas_call(
        kernel,
        out_shape=jax.ShapeDtypeStruct((N, B_pad, Hp), jnp.float32),
        grid_spec=pltpu.PrefetchScalarGridSpec(
            num_scalar_prefetch=0,
            grid=(num_b_tiles,),
            in_specs=[
                pl.BlockSpec((N, b_tile, Hx), lambda b: (0, b, 0)),
                pl.BlockSpec((L, Hx, Hp), lambda b: (0, 0, 0)),
                pl.BlockSpec((L, Hp, Hp), lambda b: (0, 0, 0)),
                pl.BlockSpec((L, 1, Hp), lambda b: (0, 0, 0)),
                pl.BlockSpec((L, 1, Hp), lambda b: (0, 0, 0)),
            ],
            out_specs=pl.BlockSpec((N, b_tile, Hp), lambda b: (0, b, 0)),
        ),
        compiler_params=pltpu.CompilerParams(
            dimension_semantics=("parallel",),   # batch tiles across TCs (v7x)
        ),
    )(x_pad, wi_all, wh_all, bi_all, bhn_all)


# ---------------------------------------------------------------------------
# Parameter init (nn.GRU shapes, U(-1/sqrt(H), 1/sqrt(H))) and one-time prep:
# gate packing [n|z|r|z] into a single 128-lane block, transpose, zero-pad,
# b_hh folding, bf16 cast.  No layout work remains on the per-call path.
# ---------------------------------------------------------------------------
def init_rnn_decoder_params(key, in_dim, hid_dim, n_layers):
    params = []
    bound = 1.0 / math.sqrt(hid_dim)
    for layer in range(n_layers):
        d_in = in_dim if layer == 0 else hid_dim
        key, k1, k2, k3, k4 = jax.random.split(key, 5)
        w_ih = jax.random.uniform(k1, (3 * hid_dim, d_in), jnp.float32, -bound, bound)
        w_hh = jax.random.uniform(k2, (3 * hid_dim, hid_dim), jnp.float32, -bound, bound)
        b_ih = jax.random.uniform(k3, (3 * hid_dim,), jnp.float32, -bound, bound)
        b_hh = jax.random.uniform(k4, (3 * hid_dim,), jnp.float32, -bound, bound)
        params.append((w_ih, w_hh, b_ih, b_hh))
    return params


def prepare_decoder_params(params, in_dim, hid_dim):
    assert hid_dim <= SLOT, "packed-gate layout requires hid_dim <= 32"
    assert in_dim <= LANE, "single-lane-block input layout requires in_dim <= 128"
    L = len(params)
    H = hid_dim
    wi_all = np.zeros((L, LANE, LANE), np.float32)
    wh_all = np.zeros((L, LANE, LANE), np.float32)
    bi_all = np.zeros((L, 1, LANE), np.float32)
    bhn_all = np.zeros((L, 1, LANE), np.float32)
    for l, (w_ih, w_hh, b_ih, b_hh) in enumerate(params):
        w_ih, w_hh = np.asarray(w_ih), np.asarray(w_hh)
        b_ih, b_hh = np.asarray(b_ih), np.asarray(b_hh)
        d_in = w_ih.shape[1]
        W_ir, W_iz, W_in = w_ih[:H], w_ih[H:2 * H], w_ih[2 * H:]
        W_hr, W_hz, W_hn = w_hh[:H], w_hh[H:2 * H], w_hh[2 * H:]
        b_ir, b_iz, b_in = b_ih[:H], b_ih[H:2 * H], b_ih[2 * H:]
        b_hr, b_hz, b_hn = b_hh[:H], b_hh[H:2 * H], b_hh[2 * H:]
        packing = [
            (OFF_N, W_in, W_hn, b_in),              # b_hn stays inside r*(.)
            (OFF_Z, W_iz, W_hz, b_iz + b_hz),       # b_hh folded for z
            (OFF_R, W_ir, W_hr, b_ir + b_hr),       # b_hh folded for r
            (OFF_Z2, W_iz, W_hz, b_iz + b_hz),      # duplicated z columns
        ]
        for off, Wi, Wh, bias in packing:
            wi_all[l, :d_in, off:off + H] = Wi.T
            wh_all[l, :H, off:off + H] = Wh.T
            bi_all[l, 0, off:off + H] = bias
        bhn_all[l, 0, OFF_N:OFF_N + H] = b_hn
    return (jnp.asarray(wi_all, jnp.bfloat16), jnp.asarray(wh_all, jnp.bfloat16),
            jnp.asarray(bi_all), jnp.asarray(bhn_all))


def rnn_decoder_forward(x, prepared, hid_dim):
    """Equivalent of RNNDecoder.forward: x (B, N, K) -> decoder_out (B, N, H)."""
    wi_all, wh_all, bi_all, bhn_all = prepared
    B, N, K = x.shape
    Hx = wi_all.shape[1]
    B_TILE = 8
    B_pad = _round_up(B, B_TILE)

    x_tm = jnp.transpose(x, (1, 0, 2))                       # (N, B, K) time-major
    x_pad = jnp.zeros((N, B_pad, Hx), jnp.float32).at[:, :B, :K].set(x_tm)

    out = gru_decoder_stack(x_pad, wi_all, wh_all, bi_all, bhn_all, b_tile=B_TILE)
    return jnp.transpose(out[:, :B, :hid_dim], (1, 0, 2))    # (B, N, H)


# ---------------------------------------------------------------------------
# Pure-JAX f32 reference (raw, unpadded params) for correctness checking.
# ---------------------------------------------------------------------------
def gru_reference(x, params, hid_dim):
    B, N, _ = x.shape
    H = hid_dim
    h_in = x
    for (w_ih, w_hh, b_ih, b_hh) in params:
        def cell(h_prev, x_t):
            gi = x_t @ w_ih.T + b_ih
            gh = h_prev @ w_hh.T + b_hh
            r = jax.nn.sigmoid(gi[:, :H] + gh[:, :H])
            z = jax.nn.sigmoid(gi[:, H:2 * H] + gh[:, H:2 * H])
            n = jnp.tanh(gi[:, 2 * H:] + r * gh[:, 2 * H:])
            h_new = (1.0 - z) * n + z * h_prev
            return h_new, h_new
        h0 = jnp.zeros((B, H), x.dtype)
        _, ys = lax.scan(cell, h0, jnp.transpose(h_in, (1, 0, 2)))
        h_in = jnp.transpose(ys, (1, 0, 2))
    return h_in


if __name__ == "__main__":
    # Small shapes consistent with the module: (b, n, k) = (2, 8, 8), hid=32, 2 layers.
    B, N, K = 2, 8, 8
    HID = 32
    N_LAYERS = 2

    key = jax.random.PRNGKey(0)
    key, xk, pk = jax.random.split(key, 3)
    x = jax.random.normal(xk, (B, N, K), dtype=jnp.float32)
    params = init_rnn_decoder_params(pk, K, HID, N_LAYERS)
    prepared = prepare_decoder_params(params, K, HID)

    out = jax.block_until_ready(rnn_decoder_forward(x, prepared, HID))
    ref = jax.block_until_ready(gru_reference(x, params, HID))

    assert out.shape == (B, N, HID), out.shape
    # bf16 matmul operands (f32 accumulation / gate math) -> loosened tolerance.
    np.testing.assert_allclose(np.asarray(out), np.asarray(ref), rtol=3e-2, atol=3e-2)

    print("KERNEL_OK")
</pallas_src>

<mosaic_0001>
module attributes {stable_mosaic.version = 11 : i64} {
  func.func @_gru_stack_kernel(%arg0: i32, %arg1: memref<8x8x128xf32, #tpu.memory_space<vmem>>, %arg2: memref<2x128x128xbf16, #tpu.memory_space<vmem>>, %arg3: memref<2x128x128xbf16, #tpu.memory_space<vmem>>, %arg4: memref<2x1x128xf32, #tpu.memory_space<vmem>>, %arg5: memref<2x1x128xf32, #tpu.memory_space<vmem>>, %arg6: memref<8x8x128xf32, #tpu.memory_space<vmem>>) attributes {dimension_semantics = [#tpu.dimension_semantics<parallel>], iteration_bounds = array<i64: 1>, scalar_prefetch = 0 : i64, scratch_operands = 0 : i64, tpu.core_type = #tpu.core_type<tc>, window_params = [{transform_indices = @transform_0, window_bounds = array<i64: 8, 8, 128>}, {pipeline_mode = #tpu.pipeline_mode<synchronous>, transform_indices = @transform_1, window_bounds = array<i64: 2, 128, 128>}, {pipeline_mode = #tpu.pipeline_mode<synchronous>, transform_indices = @transform_2, window_bounds = array<i64: 2, 128, 128>}, {pipeline_mode = #tpu.pipeline_mode<synchronous>, transform_indices = @transform_3, window_bounds = array<i64: 2, 1, 128>}, {pipeline_mode = #tpu.pipeline_mode<synchronous>, transform_indices = @transform_4, window_bounds = array<i64: 2, 1, 128>}, {transform_indices = @transform_5, window_bounds = array<i64: 8, 8, 128>}]} {
    %c0 = arith.constant 0 : index
    %c0_0 = arith.constant 0 : index
    %c0_1 = arith.constant 0 : index
    %0 = vector.load %arg2[%c0, %c0_0, %c0_1] : memref<2x128x128xbf16, #tpu.memory_space<vmem>>, vector<1x128x128xbf16>
    %1 = vector.shape_cast %0 : vector<1x128x128xbf16> to vector<128x128xbf16>
    %c1 = arith.constant 1 : index
    %c0_2 = arith.constant 0 : index
    %c0_3 = arith.constant 0 : index
    %2 = vector.load %arg2[%c1, %c0_2, %c0_3] : memref<2x128x128xbf16, #tpu.memory_space<vmem>>, vector<1x128x128xbf16>
    %3 = vector.shape_cast %2 : vector<1x128x128xbf16> to vector<128x128xbf16>
    %c0_4 = arith.constant 0 : index
    %c0_5 = arith.constant 0 : index
    %c0_6 = arith.constant 0 : index
    %4 = vector.load %arg3[%c0_4, %c0_5, %c0_6] : memref<2x128x128xbf16, #tpu.memory_space<vmem>>, vector<1x128x128xbf16>
    %5 = vector.shape_cast %4 : vector<1x128x128xbf16> to vector<128x128xbf16>
    %c1_7 = arith.constant 1 : index
    %c0_8 = arith.constant 0 : index
    %c0_9 = arith.constant 0 : index
    %6 = vector.load %arg3[%c1_7, %c0_8, %c0_9] : memref<2x128x128xbf16, #tpu.memory_space<vmem>>, vector<1x128x128xbf16>
    %7 = vector.shape_cast %6 : vector<1x128x128xbf16> to vector<128x128xbf16>
    %c1_10 = arith.constant 1 : index
    %c0_11 = arith.constant 0 : index
    %c0_12 = arith.constant 0 : index
    %8 = vector.load %arg4[%c1_10, %c0_11, %c0_12] : memref<2x1x128xf32, #tpu.memory_space<vmem>>, vector<1x1x128xf32>
    %9 = vector.shape_cast %8 : vector<1x1x128xf32> to vector<1x128xf32>
    %10 = vector.shape_cast %9 : vector<1x128xf32> to vector<1x128xf32>
    %11 = vector.broadcast %10 : vector<1x128xf32> to vector<8x128xf32>
    %c0_13 = arith.constant 0 : index
    %c0_14 = arith.constant 0 : index
    %c0_15 = arith.constant 0 : index
    %12 = vector.load %arg5[%c0_13, %c0_14, %c0_15] : memref<2x1x128xf32, #tpu.memory_space<vmem>>, vector<1x1x128xf32>
    %13 = vector.shape_cast %12 : vector<1x1x128xf32> to vector<1x128xf32>
    %14 = vector.shape_cast %13 : vector<1x128xf32> to vector<1x128xf32>
    %15 = vector.broadcast %14 : vector<1x128xf32> to vector<8x128xf32>
    %c1_16 = arith.constant 1 : index
    %c0_17 = arith.constant 0 : index
    %c0_18 = arith.constant 0 : index
    %16 = vector.load %arg5[%c1_16, %c0_17, %c0_18] : memref<2x1x128xf32, #tpu.memory_space<vmem>>, vector<1x1x128xf32>
    %17 = vector.shape_cast %16 : vector<1x1x128xf32> to vector<1x128xf32>
    %18 = vector.shape_cast %17 : vector<1x128xf32> to vector<1x128xf32>
    %19 = vector.broadcast %18 : vector<1x128xf32> to vector<8x128xf32>
    %c0_19 = arith.constant 0 : index
    %c0_20 = arith.constant 0 : index
    %c0_21 = arith.constant 0 : index
    %20 = vector.load %arg1[%c0_19, %c0_20, %c0_21] : memref<8x8x128xf32, #tpu.memory_space<vmem>>, vector<8x8x128xf32>
    %21 = vector.shape_cast %20 : vector<8x8x128xf32> to vector<64x128xf32>
    %22 = arith.truncf %21 : vector<64x128xf32> to vector<64x128xbf16>
    %cst = arith.constant dense<0.000000e+00> : vector<64x128xf32>
    %23 = tpu.matmul %22, %1, %cst {dimension_numbers = #tpu.dot_dimension_numbers<[1], [0], [0], [1], [0, 0, 1, 1], [], []>} : vector<64x128xbf16>, vector<128x128xbf16>, vector<64x128xf32> -> vector<64x128xf32>
    %c0_22 = arith.constant 0 : index
    %c0_23 = arith.constant 0 : index
    %c0_24 = arith.constant 0 : index
    %24 = vector.load %arg4[%c0_22, %c0_23, %c0_24] : memref<2x1x128xf32, #tpu.memory_space<vmem>>, vector<1x1x128xf32>
    %25 = vector.shape_cast %24 : vector<1x1x128xf32> to vector<1x128xf32>
    %26 = vector.shape_cast %25 : vector<1x128xf32> to vector<1x128xf32>
    %27 = vector.broadcast %26 : vector<1x128xf32> to vector<64x128xf32>
    %28 = arith.addf %23, %27 : vector<64x128xf32>
    %29 = vector.extract_strided_slice %28 {offsets = [0, 0], sizes = [8, 128], strides = [1, 1]} : vector<64x128xf32> to vector<8x128xf32>
    %30 = arith.negf %29 : vector<8x128xf32>
    %31 = math.exp %30 : vector<8x128xf32>
    %cst_25 = arith.constant 1.000000e+00 : f32
    %32 = vector.broadcast %cst_25 : f32 to vector<8x128xf32>
    %33 = arith.addf %32, %31 : vector<8x128xf32>
    %34 = arith.divf %32, %33 : vector<8x128xf32>
    %c64_i32 = arith.constant 64 : i32
    %35 = tpu.dynamic_rotate %34 by %c64_i32 dim 1 : vector<8x128xf32>, i32 -> vector<8x128xf32>
    %c32_i32 = arith.constant 32 : i32
    %36 = tpu.dynamic_rotate %34 by %c32_i32 dim 1 : vector<8x128xf32>, i32 -> vector<8x128xf32>
    %37 = arith.mulf %35, %15 : vector<8x128xf32>
    %38 = arith.addf %29, %37 : vector<8x128xf32>
    %39 = math.tanh %38 : vector<8x128xf32>
    %40 = arith.mulf %36, %39 : vector<8x128xf32>
    %41 = arith.subf %39, %40 : vector<8x128xf32>
    %42 = arith.truncf %41 : vector<8x128xf32> to vector<8x128xbf16>
    %cst_26 = arith.constant dense<0.000000e+00> : vector<8x128xf32>
    %43 = tpu.matmul %42, %3, %cst_26 {dimension_numbers = #tpu.dot_dimension_numbers<[1], [0], [0], [1], [0, 0, 1, 1], [], []>} : vector<8x128xbf16>, vector<128x128xbf16>, vector<8x128xf32> -> vector<8x128xf32>
    %44 = arith.addf %43, %11 : vector<8x128xf32>
    %45 = arith.negf %44 : vector<8x128xf32>
    %46 = math.exp %45 : vector<8x128xf32>
    %cst_27 = arith.constant 1.000000e+00 : f32
    %47 = vector.broadcast %cst_27 : f32 to vector<8x128xf32>
    %48 = arith.addf %47, %46 : vector<8x128xf32>
    %49 = arith.divf %47, %48 : vector<8x128xf32>
    %c64_i32_28 = arith.constant 64 : i32
    %50 = tpu.dynamic_rotate %49 by %c64_i32_28 dim 1 : vector<8x128xf32>, i32 -> vector<8x128xf32>
    %c32_i32_29 = arith.constant 32 : i32
    %51 = tpu.dynamic_rotate %49 by %c32_i32_29 dim 1 : vector<8x128xf32>, i32 -> vector<8x128xf32>
    %52 = arith.mulf %50, %19 : vector<8x128xf32>
    %53 = arith.addf %44, %52 : vector<8x128xf32>
    %54 = math.tanh %53 : vector<8x128xf32>
    %55 = arith.mulf %51, %54 : vector<8x128xf32>
    %56 = arith.subf %54, %55 : vector<8x128xf32>
    %57 = arith.truncf %56 : vector<8x128xf32> to vector<8x128xbf16>
    %c0_30 = arith.constant 0 : index
    %c0_31 = arith.constant 0 : index
    %c0_32 = arith.constant 0 : index
    %58 = vector.load %arg6[%c0_30, %c0_31, %c0_32] : memref<8x8x128xf32, #tpu.memory_space<vmem>>, vector<1x8x128xf32>
    %59 = vector.shape_cast %58 : vector<1x8x128xf32> to vector<8x128xf32>
    %60 = vector.shape_cast %56 : vector<8x128xf32> to vector<1x8x128xf32>
    tpu.vector_store %arg6[%c0_30, %c0_31, %c0_32], %60 {strides = array<i32>} : memref<8x8x128xf32, #tpu.memory_space<vmem>>, vector<1x8x128xf32>,
    %61 = vector.extract_strided_slice %28 {offsets = [8, 0], sizes = [8, 128], strides = [1, 1]} : vector<64x128xf32> to vector<8x128xf32>
    %cst_33 = arith.constant dense<0.000000e+00> : vector<8x128xf32>
    %62 = tpu.matmul %42, %5, %cst_33 {dimension_numbers = #tpu.dot_dimension_numbers<[1], [0], [0], [1], [0, 0, 1, 1], [], []>} : vector<8x128xbf16>, vector<128x128xbf16>, vector<8x128xf32> -> vector<8x128xf32>
    %63 = arith.addf %61, %62 : vector<8x128xf32>
    %64 = arith.negf %63 : vector<8x128xf32>
    %65 = math.exp %64 : vector<8x128xf32>
    %cst_34 = arith.constant 1.000000e+00 : f32
    %66 = vector.broadcast %cst_34 : f32 to vector<8x128xf32>
    %67 = arith.addf %66, %65 : vector<8x128xf32>
    %68 = arith.divf %66, %67 : vector<8x128xf32>
    %c64_i32_35 = arith.constant 64 : i32
    %69 = tpu.dynamic_rotate %68 by %c64_i32_35 dim 1 : vector<8x128xf32>, i32 -> vector<8x128xf32>
    %c32_i32_36 = arith.constant 32 : i32
    %70 = tpu.dynamic_rotate %68 by %c32_i32_36 dim 1 : vector<8x128xf32>, i32 -> vector<8x128xf32>
    %71 = arith.addf %62, %15 : vector<8x128xf32>
    %72 = arith.mulf %69, %71 : vector<8x128xf32>
    %73 = arith.addf %61, %72 : vector<8x128xf32>
    %74 = math.tanh %73 : vector<8x128xf32>
    %75 = arith.subf %41, %74 : vector<8x128xf32>
    %76 = arith.mulf %70, %75 : vector<8x128xf32>
    %77 = arith.addf %74, %76 : vector<8x128xf32>
    %78 = arith.truncf %77 : vector<8x128xf32> to vector<8x128xbf16>
    %cst_37 = arith.constant dense<0.000000e+00> : vector<8x128xf32>
    %79 = tpu.matmul %78, %3, %cst_37 {dimension_numbers = #tpu.dot_dimension_numbers<[1], [0], [0], [1], [0, 0, 1, 1], [], []>} : vector<8x128xbf16>, vector<128x128xbf16>, vector<8x128xf32> -> vector<8x128xf32>
    %80 = arith.addf %79, %11 : vector<8x128xf32>
    %cst_38 = arith.constant dense<0.000000e+00> : vector<8x128xf32>
    %81 = tpu.matmul %57, %7, %cst_38 {dimension_numbers = #tpu.dot_dimension_numbers<[1], [0], [0], [1], [0, 0, 1, 1], [], []>} : vector<8x128xbf16>, vector<128x128xbf16>, vector<8x128xf32> -> vector<8x128xf32>
    %82 = arith.addf %80, %81 : vector<8x128xf32>
    %83 = arith.negf %82 : vector<8x128xf32>
    %84 = math.exp %83 : vector<8x128xf32>
    %cst_39 = arith.constant 1.000000e+00 : f32
    %85 = vector.broadcast %cst_39 : f32 to vector<8x128xf32>
    %86 = arith.addf %85, %84 : vector<8x128xf32>
    %87 = arith.divf %85, %86 : vector<8x128xf32>
    %c64_i32_40 = arith.constant 64 : i32
    %88 = tpu.dynamic_rotate %87 by %c64_i32_40 dim 1 : vector<8x128xf32>, i32 -> vector<8x128xf32>
    %c32_i32_41 = arith.constant 32 : i32
    %89 = tpu.dynamic_rotate %87 by %c32_i32_41 dim 1 : vector<8x128xf32>, i32 -> vector<8x128xf32>
    %90 = arith.addf %81, %19 : vector<8x128xf32>
    %91 = arith.mulf %88, %90 : vector<8x128xf32>
    %92 = arith.addf %80, %91 : vector<8x128xf32>
    %93 = math.tanh %92 : vector<8x128xf32>
    %94 = arith.subf %56, %93 : vector<8x128xf32>
    %95 = arith.mulf %89, %94 : vector<8x128xf32>
    %96 = arith.addf %93, %95 : vector<8x128xf32>
    %97 = arith.truncf %96 : vector<8x128xf32> to vector<8x128xbf16>
    %c1_42 = arith.constant 1 : index
    %c0_43 = arith.constant 0 : index
    %c0_44 = arith.constant 0 : index
    %98 = vector.load %arg6[%c1_42, %c0_43, %c0_44] : memref<8x8x128xf32, #tpu.memory_space<vmem>>, vector<1x8x128xf32>
    %99 = vector.shape_cast %98 : vector<1x8x128xf32> to vector<8x128xf32>
    %100 = vector.shape_cast %96 : vector<8x128xf32> to vector<1x8x128xf32>
    tpu.vector_store %arg6[%c1_42, %c0_43, %c0_44], %100 {strides = array<i32>} : memref<8x8x128xf32, #tpu.memory_space<vmem>>, vector<1x8x128xf32>,
    %101 = vector.extract_strided_slice %28 {offsets = [16, 0], sizes = [8, 128], strides = [1, 1]} : vector<64x128xf32> to vector<8x128xf32>
    %cst_45 = arith.constant dense<0.000000e+00> : vector<8x128xf32>
    %102 = tpu.matmul %78, %5, %cst_45 {dimension_numbers = #tpu.dot_dimension_numbers<[1], [0], [0], [1], [0, 0, 1, 1], [], []>} : vector<8x128xbf16>, vector<128x128xbf16>, vector<8x128xf32> -> vector<8x128xf32>
    %103 = arith.addf %101, %102 : vector<8x128xf32>
    %104 = arith.negf %103 : vector<8x128xf32>
    %105 = math.exp %104 : vector<8x128xf32>
    %cst_46 = arith.constant 1.000000e+00 : f32
    %106 = vector.broadcast %cst_46 : f32 to vector<8x128xf32>
    %107 = arith.addf %106, %105 : vector<8x128xf32>
    %108 = arith.divf %106, %107 : vector<8x128xf32>
    %c64_i32_47 = arith.constant 64 : i32
    %109 = tpu.dynamic_rotate %108 by %c64_i32_47 dim 1 : vector<8x128xf32>, i32 -> vector<8x128xf32>
    %c32_i32_48 = arith.constant 32 : i32
    %110 = tpu.dynamic_rotate %108 by %c32_i32_48 dim 1 : vector<8x128xf32>, i32 -> vector<8x128xf32>
    %111 = arith.addf %102, %15 : vector<8x128xf32>
    %112 = arith.mulf %109, %111 : vector<8x128xf32>
    %113 = arith.addf %101, %112 : vector<8x128xf32>
    %114 = math.tanh %113 : vector<8x128xf32>
    %115 = arith.subf %77, %114 : vector<8x128xf32>
    %116 = arith.mulf %110, %115 : vector<8x128xf32>
    %117 = arith.addf %114, %116 : vector<8x128xf32>
    %118 = arith.truncf %117 : vector<8x128xf32> to vector<8x128xbf16>
    %cst_49 = arith.constant dense<0.000000e+00> : vector<8x128xf32>
    %119 = tpu.matmul %118, %3, %cst_49 {dimension_numbers = #tpu.dot_dimension_numbers<[1], [0], [0], [1], [0, 0, 1, 1], [], []>} : vector<8x128xbf16>, vector<128x128xbf16>, vector<8x128xf32> -> vector<8x128xf32>
    %120 = arith.addf %119, %11 : vector<8x128xf32>
    %cst_50 = arith.constant dense<0.000000e+00> : vector<8x128xf32>
    %121 = tpu.matmul %97, %7, %cst_50 {dimension_numbers = #tpu.dot_dimension_numbers<[1], [0], [0], [1], [0, 0, 1, 1], [], []>} : vector<8x128xbf16>, vector<128x128xbf16>, vector<8x128xf32> -> vector<8x128xf32>
    %122 = arith.addf %120, %121 : vector<8x128xf32>
    %123 = arith.negf %122 : vector<8x128xf32>
    %124 = math.exp %123 : vector<8x128xf32>
    %cst_51 = arith.constant 1.000000e+00 : f32
    %125 = vector.broadcast %cst_51 : f32 to vector<8x128xf32>
    %126 = arith.addf %125, %124 : vector<8x128xf32>
    %127 = arith.divf %125, %126 : vector<8x128xf32>
    %c64_i32_52 = arith.constant 64 : i32
    %128 = tpu.dynamic_rotate %127 by %c64_i32_52 dim 1 : vector<8x128xf32>, i32 -> vector<8x128xf32>
    %c32_i32_53 = arith.constant 32 : i32
    %129 = tpu.dynamic_rotate %127 by %c32_i32_53 dim 1 : vector<8x128xf32>, i32 -> vector<8x128xf32>
    %130 = arith.addf %121, %19 : vector<8x128xf32>
    %131 = arith.mulf %128, %130 : vector<8x128xf32>
    %132 = arith.addf %120, %131 : vector<8x128xf32>
    %133 = math.tanh %132 : vector<8x128xf32>
    %134 = arith.subf %96, %133 : vector<8x128xf32>
    %135 = arith.mulf %129, %134 : vector<8x128xf32>
    %136 = arith.addf %133, %135 : vector<8x128xf32>
    %137 = arith.truncf %136 : vector<8x128xf32> to vector<8x128xbf16>
    %c2 = arith.constant 2 : index
    %c0_54 = arith.constant 0 : index
    %c0_55 = arith.constant 0 : index
    %138 = vector.load %arg6[%c2, %c0_54, %c0_55] : memref<8x8x128xf32, #tpu.memory_space<vmem>>, vector<1x8x128xf32>
    %139 = vector.shape_cast %138 : vector<1x8x128xf32> to vector<8x128xf32>
    %140 = vector.shape_cast %136 : vector<8x128xf32> to vector<1x8x128xf32>
    tpu.vector_store %arg6[%c2, %c0_54, %c0_55], %140 {strides = array<i32>} : memref<8x8x128xf32, #tpu.memory_space<vmem>>, vector<1x8x128xf32>,
    %141 = vector.extract_strided_slice %28 {offsets = [24, 0], sizes = [8, 128], strides = [1, 1]} : vector<64x128xf32> to vector<8x128xf32>
    %cst_56 = arith.constant dense<0.000000e+00> : vector<8x128xf32>
    %142 = tpu.matmul %118, %5, %cst_56 {dimension_numbers = #tpu.dot_dimension_numbers<[1], [0], [0], [1], [0, 0, 1, 1], [], []>} : vector<8x128xbf16>, vector<128x128xbf16>, vector<8x128xf32> -> vector<8x128xf32>
    %143 = arith.addf %141, %142 : vector<8x128xf32>
    %144 = arith.negf %143 : vector<8x128xf32>
    %145 = math.exp %144 : vector<8x128xf32>
    %cst_57 = arith.constant 1.000000e+00 : f32
    %146 = vector.broadcast %cst_57 : f32 to vector<8x128xf32>
    %147 = arith.addf %146, %145 : vector<8x128xf32>
    %148 = arith.divf %146, %147 : vector<8x128xf32>
    %c64_i32_58 = arith.constant 64 : i32
    %149 = tpu.dynamic_rotate %148 by %c64_i32_58 dim 1 : vector<8x128xf32>, i32 -> vector<8x128xf32>
    %c32_i32_59 = arith.constant 32 : i32
    %150 = tpu.dynamic_rotate %148 by %c32_i32_59 dim 1 : vector<8x128xf32>, i32 -> vector<8x128xf32>
    %151 = arith.addf %142, %15 : vector<8x128xf32>
    %152 = arith.mulf %149, %151 : vector<8x128xf32>
    %153 = arith.addf %141, %152 : vector<8x128xf32>
    %154 = math.tanh %153 : vector<8x128xf32>
    %155 = arith.subf %117, %154 : vector<8x128xf32>
    %156 = arith.mulf %150, %155 : vector<8x128xf32>
    %157 = arith.addf %154, %156 : vector<8x128xf32>
    %158 = arith.truncf %157 : vector<8x128xf32> to vector<8x128xbf16>
    %cst_60 = arith.constant dense<0.000000e+00> : vector<8x128xf32>
    %159 = tpu.matmul %158, %3, %cst_60 {dimension_numbers = #tpu.dot_dimension_numbers<[1], [0], [0], [1], [0, 0, 1, 1], [], []>} : vector<8x128xbf16>, vector<128x128xbf16>, vector<8x128xf32> -> vector<8x128xf32>
    %160 = arith.addf %159, %11 : vector<8x128xf32>
    %cst_61 = arith.constant dense<0.000000e+00> : vector<8x128xf32>
    %161 = tpu.matmul %137, %7, %cst_61 {dimension_numbers = #tpu.dot_dimension_numbers<[1], [0], [0], [1], [0, 0, 1, 1], [], []>} : vector<8x128xbf16>, vector<128x128xbf16>, vector<8x128xf32> -> vector<8x128xf32>
    %162 = arith.addf %160, %161 : vector<8x128xf32>
    %163 = arith.negf %162 : vector<8x128xf32>
    %164 = math.exp %163 : vector<8x128xf32>
    %cst_62 = arith.constant 1.000000e+00 : f32
    %165 = vector.broadcast %cst_62 : f32 to vector<8x128xf32>
    %166 = arith.addf %165, %164 : vector<8x128xf32>
    %167 = arith.divf %165, %166 : vector<8x128xf32>
    %c64_i32_63 = arith.constant 64 : i32
    %168 = tpu.dynamic_rotate %167 by %c64_i32_63 dim 1 : vector<8x128xf32>, i32 -> vector<8x128xf32>
    %c32_i32_64 = arith.constant 32 : i32
    %169 = tpu.dynamic_rotate %167 by %c32_i32_64 dim 1 : vector<8x128xf32>, i32 -> vector<8x128xf32>
    %170 = arith.addf %161, %19 : vector<8x128xf32>
    %171 = arith.mulf %168, %170 : vector<8x128xf32>
    %172 = arith.addf %160, %171 : vector<8x128xf32>
    %173 = math.tanh %172 : vector<8x128xf32>
    %174 = arith.subf %136, %173 : vector<8x128xf32>
    %175 = arith.mulf %169, %174 : vector<8x128xf32>
    %176 = arith.addf %173, %175 : vector<8x128xf32>
    %177 = arith.truncf %176 : vector<8x128xf32> to vector<8x128xbf16>
    %c3 = arith.constant 3 : index
    %c0_65 = arith.constant 0 : index
    %c0_66 = arith.constant 0 : index
    %178 = vector.load %arg6[%c3, %c0_65, %c0_66] : memref<8x8x128xf32, #tpu.memory_space<vmem>>, vector<1x8x128xf32>
    %179 = vector.shape_cast %178 : vector<1x8x128xf32> to vector<8x128xf32>
    %180 = vector.shape_cast %176 : vector<8x128xf32> to vector<1x8x128xf32>
    tpu.vector_store %arg6[%c3, %c0_65, %c0_66], %180 {strides = array<i32>} : memref<8x8x128xf32, #tpu.memory_space<vmem>>, vector<1x8x128xf32>,
    %181 = vector.extract_strided_slice %28 {offsets = [32, 0], sizes = [8, 128], strides = [1, 1]} : vector<64x128xf32> to vector<8x128xf32>
    %cst_67 = arith.constant dense<0.000000e+00> : vector<8x128xf32>
    %182 = tpu.matmul %158, %5, %cst_67 {dimension_numbers = #tpu.dot_dimension_numbers<[1], [0], [0], [1], [0, 0, 1, 1], [], []>} : vector<8x128xbf16>, vector<128x128xbf16>, vector<8x128xf32> -> vector<8x128xf32>
    %183 = arith.addf %181, %182 : vector<8x128xf32>
    %184 = arith.negf %183 : vector<8x128xf32>
    %185 = math.exp %184 : vector<8x128xf32>
    %cst_68 = arith.constant 1.000000e+00 : f32
    %186 = vector.broadcast %cst_68 : f32 to vector<8x128xf32>
    %187 = arith.addf %186, %185 : vector<8x128xf32>
    %188 = arith.divf %186, %187 : vector<8x128xf32>
    %c64_i32_69 = arith.constant 64 : i32
    %189 = tpu.dynamic_rotate %188 by %c64_i32_69 dim 1 : vector<8x128xf32>, i32 -> vector<8x128xf32>
    %c32_i32_70 = arith.constant 32 : i32
    %190 = tpu.dynamic_rotate %188 by %c32_i32_70 dim 1 : vector<8x128xf32>, i32 -> vector<8x128xf32>
    %191 = arith.addf %182, %15 : vector<8x128xf32>
    %192 = arith.mulf %189, %191 : vector<8x128xf32>
    %193 = arith.addf %181, %192 : vector<8x128xf32>
    %194 = math.tanh %193 : vector<8x128xf32>
    %195 = arith.subf %157, %194 : vector<8x128xf32>
    %196 = arith.mulf %190, %195 : vector<8x128xf32>
    %197 = arith.addf %194, %196 : vector<8x128xf32>
    %198 = arith.truncf %197 : vector<8x128xf32> to vector<8x128xbf16>
    %cst_71 = arith.constant dense<0.000000e+00> : vector<8x128xf32>
    %199 = tpu.matmul %198, %3, %cst_71 {dimension_numbers = #tpu.dot_dimension_numbers<[1], [0], [0], [1], [0, 0, 1, 1], [], []>} : vector<8x128xbf16>, vector<128x128xbf16>, vector<8x128xf32> -> vector<8x128xf32>
    %200 = arith.addf %199, %11 : vector<8x128xf32>
    %cst_72 = arith.constant dense<0.000000e+00> : vector<8x128xf32>
    %201 = tpu.matmul %177, %7, %cst_72 {dimension_numbers = #tpu.dot_dimension_numbers<[1], [0], [0], [1], [0, 0, 1, 1], [], []>} : vector<8x128xbf16>, vector<128x128xbf16>, vector<8x128xf32> -> vector<8x128xf32>
    %202 = arith.addf %200, %201 : vector<8x128xf32>
    %203 = arith.negf %202 : vector<8x128xf32>
    %204 = math.exp %203 : vector<8x128xf32>
    %cst_73 = arith.constant 1.000000e+00 : f32
    %205 = vector.broadcast %cst_73 : f32 to vector<8x128xf32>
    %206 = arith.addf %205, %204 : vector<8x128xf32>
    %207 = arith.divf %205, %206 : vector<8x128xf32>
    %c64_i32_74 = arith.constant 64 : i32
    %208 = tpu.dynamic_rotate %207 by %c64_i32_74 dim 1 : vector<8x128xf32>, i32 -> vector<8x128xf32>
    %c32_i32_75 = arith.constant 32 : i32
    %209 = tpu.dynamic_rotate %207 by %c32_i32_75 dim 1 : vector<8x128xf32>, i32 -> vector<8x128xf32>
    %210 = arith.addf %201, %19 : vector<8x128xf32>
    %211 = arith.mulf %208, %210 : vector<8x128xf32>
    %212 = arith.addf %200, %211 : vector<8x128xf32>
    %213 = math.tanh %212 : vector<8x128xf32>
    %214 = arith.subf %176, %213 : vector<8x128xf32>
    %215 = arith.mulf %209, %214 : vector<8x128xf32>
    %216 = arith.addf %213, %215 : vector<8x128xf32>
    %217 = arith.truncf %216 : vector<8x128xf32> to vector<8x128xbf16>
    %c4 = arith.constant 4 : index
    %c0_76 = arith.constant 0 : index
    %c0_77 = arith.constant 0 : index
    %218 = vector.load %arg6[%c4, %c0_76, %c0_77] : memref<8x8x128xf32, #tpu.memory_space<vmem>>, vector<1x8x128xf32>
    %219 = vector.shape_cast %218 : vector<1x8x128xf32> to vector<8x128xf32>
    %220 = vector.shape_cast %216 : vector<8x128xf32> to vector<1x8x128xf32>
    tpu.vector_store %arg6[%c4, %c0_76, %c0_77], %220 {strides = array<i32>} : memref<8x8x128xf32, #tpu.memory_space<vmem>>, vector<1x8x128xf32>,
    %221 = vector.extract_strided_slice %28 {offsets = [40, 0], sizes = [8, 128], strides = [1, 1]} : vector<64x128xf32> to vector<8x128xf32>
    %cst_78 = arith.constant dense<0.000000e+00> : vector<8x128xf32>
    %222 = tpu.matmul %198, %5, %cst_78 {dimension_numbers = #tpu.dot_dimension_numbers<[1], [0], [0], [1], [0, 0, 1, 1], [], []>} : vector<8x128xbf16>, vector<128x128xbf16>, vector<8x128xf32> -> vector<8x128xf32>
    %223 = arith.addf %221, %222 : vector<8x128xf32>
    %224 = arith.negf %223 : vector<8x128xf32>
    %225 = math.exp %224 : vector<8x128xf32>
    %cst_79 = arith.constant 1.000000e+00 : f32
    %226 = vector.broadcast %cst_79 : f32 to vector<8x128xf32>
    %227 = arith.addf %226, %225 : vector<8x128xf32>
    %228 = arith.divf %226, %227 : vector<8x128xf32>
    %c64_i32_80 = arith.constant 64 : i32
    %229 = tpu.dynamic_rotate %228 by %c64_i32_80 dim 1 : vector<8x128xf32>, i32 -> vector<8x128xf32>
    %c32_i32_81 = arith.constant 32 : i32
    %230 = tpu.dynamic_rotate %228 by %c32_i32_81 dim 1 : vector<8x128xf32>, i32 -> vector<8x128xf32>
    %231 = arith.addf %222, %15 : vector<8x128xf32>
    %232 = arith.mulf %229, %231 : vector<8x128xf32>
    %233 = arith.addf %221, %232 : vector<8x128xf32>
    %234 = math.tanh %233 : vector<8x128xf32>
    %235 = arith.subf %197, %234 : vector<8x128xf32>
    %236 = arith.mulf %230, %235 : vector<8x128xf32>
    %237 = arith.addf %234, %236 : vector<8x128xf32>
    %238 = arith.truncf %237 : vector<8x128xf32> to vector<8x128xbf16>
    %cst_82 = arith.constant dense<0.000000e+00> : vector<8x128xf32>
    %239 = tpu.matmul %238, %3, %cst_82 {dimension_numbers = #tpu.dot_dimension_numbers<[1], [0], [0], [1], [0, 0, 1, 1], [], []>} : vector<8x128xbf16>, vector<128x128xbf16>, vector<8x128xf32> -> vector<8x128xf32>
    %240 = arith.addf %239, %11 : vector<8x128xf32>
    %cst_83 = arith.constant dense<0.000000e+00> : vector<8x128xf32>
    %241 = tpu.matmul %217, %7, %cst_83 {dimension_numbers = #tpu.dot_dimension_numbers<[1], [0], [0], [1], [0, 0, 1, 1], [], []>} : vector<8x128xbf16>, vector<128x128xbf16>, vector<8x128xf32> -> vector<8x128xf32>
    %242 = arith.addf %240, %241 : vector<8x128xf32>
    %243 = arith.negf %242 : vector<8x128xf32>
    %244 = math.exp %243 : vector<8x128xf32>
    %cst_84 = arith.constant 1.000000e+00 : f32
    %245 = vector.broadcast %cst_84 : f32 to vector<8x128xf32>
    %246 = arith.addf %245, %244 : vector<8x128xf32>
    %247 = arith.divf %245, %246 : vector<8x128xf32>
    %c64_i32_85 = arith.constant 64 : i32
    %248 = tpu.dynamic_rotate %247 by %c64_i32_85 dim 1 : vector<8x128xf32>, i32 -> vector<8x128xf32>
    %c32_i32_86 = arith.constant 32 : i32
    %249 = tpu.dynamic_rotate %247 by %c32_i32_86 dim 1 : vector<8x128xf32>, i32 -> vector<8x128xf32>
    %250 = arith.addf %241, %19 : vector<8x128xf32>
    %251 = arith.mulf %248, %250 : vector<8x128xf32>
    %252 = arith.addf %240, %251 : vector<8x128xf32>
    %253 = math.tanh %252 : vector<8x128xf32>
    %254 = arith.subf %216, %253 : vector<8x128xf32>
    %255 = arith.mulf %249, %254 : vector<8x128xf32>
    %256 = arith.addf %253, %255 : vector<8x128xf32>
    %257 = arith.truncf %256 : vector<8x128xf32> to vector<8x128xbf16>
    %c5 = arith.constant 5 : index
    %c0_87 = arith.constant 0 : index
    %c0_88 = arith.constant 0 : index
    %258 = vector.load %arg6[%c5, %c0_87, %c0_88] : memref<8x8x128xf32, #tpu.memory_space<vmem>>, vector<1x8x128xf32>
    %259 = vector.shape_cast %258 : vector<1x8x128xf32> to vector<8x128xf32>
    %260 = vector.shape_cast %256 : vector<8x128xf32> to vector<1x8x128xf32>
    tpu.vector_store %arg6[%c5, %c0_87, %c0_88], %260 {strides = array<i32>} : memref<8x8x128xf32, #tpu.memory_space<vmem>>, vector<1x8x128xf32>,
    %261 = vector.extract_strided_slice %28 {offsets = [48, 0], sizes = [8, 128], strides = [1, 1]} : vector<64x128xf32> to vector<8x128xf32>
    %cst_89 = arith.constant dense<0.000000e+00> : vector<8x128xf32>
    %262 = tpu.matmul %238, %5, %cst_89 {dimension_numbers = #tpu.dot_dimension_numbers<[1], [0], [0], [1], [0, 0, 1, 1], [], []>} : vector<8x128xbf16>, vector<128x128xbf16>, vector<8x128xf32> -> vector<8x128xf32>
    %263 = arith.addf %261, %262 : vector<8x128xf32>
    %264 = arith.negf %263 : vector<8x128xf32>
    %265 = math.exp %264 : vector<8x128xf32>
    %cst_90 = arith.constant 1.000000e+00 : f32
    %266 = vector.broadcast %cst_90 : f32 to vector<8x128xf32>
    %267 = arith.addf %266, %265 : vector<8x128xf32>
    %268 = arith.divf %266, %267 : vector<8x128xf32>
    %c64_i32_91 = arith.constant 64 : i32
    %269 = tpu.dynamic_rotate %268 by %c64_i32_91 dim 1 : vector<8x128xf32>, i32 -> vector<8x128xf32>
    %c32_i32_92 = arith.constant 32 : i32
    %270 = tpu.dynamic_rotate %268 by %c32_i32_92 dim 1 : vector<8x128xf32>, i32 -> vector<8x128xf32>
    %271 = arith.addf %262, %15 : vector<8x128xf32>
    %272 = arith.mulf %269, %271 : vector<8x128xf32>
    %273 = arith.addf %261, %272 : vector<8x128xf32>
    %274 = math.tanh %273 : vector<8x128xf32>
    %275 = arith.subf %237, %274 : vector<8x128xf32>
    %276 = arith.mulf %270, %275 : vector<8x128xf32>
    %277 = arith.addf %274, %276 : vector<8x128xf32>
    %278 = arith.truncf %277 : vector<8x128xf32> to vector<8x128xbf16>
    %cst_93 = arith.constant dense<0.000000e+00> : vector<8x128xf32>
    %279 = tpu.matmul %278, %3, %cst_93 {dimension_numbers = #tpu.dot_dimension_numbers<[1], [0], [0], [1], [0, 0, 1, 1], [], []>} : vector<8x128xbf16>, vector<128x128xbf16>, vector<8x128xf32> -> vector<8x128xf32>
    %280 = arith.addf %279, %11 : vector<8x128xf32>
    %cst_94 = arith.constant dense<0.000000e+00> : vector<8x128xf32>
    %281 = tpu.matmul %257, %7, %cst_94 {dimension_numbers = #tpu.dot_dimension_numbers<[1], [0], [0], [1], [0, 0, 1, 1], [], []>} : vector<8x128xbf16>, vector<128x128xbf16>, vector<8x128xf32> -> vector<8x128xf32>
    %282 = arith.addf %280, %281 : vector<8x128xf32>
    %283 = arith.negf %282 : vector<8x128xf32>
    %284 = math.exp %283 : vector<8x128xf32>
    %cst_95 = arith.constant 1.000000e+00 : f32
    %285 = vector.broadcast %cst_95 : f32 to vector<8x128xf32>
    %286 = arith.addf %285, %284 : vector<8x128xf32>
    %287 = arith.divf %285, %286 : vector<8x128xf32>
    %c64_i32_96 = arith.constant 64 : i32
    %288 = tpu.dynamic_rotate %287 by %c64_i32_96 dim 1 : vector<8x128xf32>, i32 -> vector<8x128xf32>
    %c32_i32_97 = arith.constant 32 : i32
    %289 = tpu.dynamic_rotate %287 by %c32_i32_97 dim 1 : vector<8x128xf32>, i32 -> vector<8x128xf32>
    %290 = arith.addf %281, %19 : vector<8x128xf32>
    %291 = arith.mulf %288, %290 : vector<8x128xf32>
    %292 = arith.addf %280, %291 : vector<8x128xf32>
    %293 = math.tanh %292 : vector<8x128xf32>
    %294 = arith.subf %256, %293 : vector<8x128xf32>
    %295 = arith.mulf %289, %294 : vector<8x128xf32>
    %296 = arith.addf %293, %295 : vector<8x128xf32>
    %297 = arith.truncf %296 : vector<8x128xf32> to vector<8x128xbf16>
    %c6 = arith.constant 6 : index
    %c0_98 = arith.constant 0 : index
    %c0_99 = arith.constant 0 : index
    %298 = vector.load %arg6[%c6, %c0_98, %c0_99] : memref<8x8x128xf32, #tpu.memory_space<vmem>>, vector<1x8x128xf32>
    %299 = vector.shape_cast %298 : vector<1x8x128xf32> to vector<8x128xf32>
    %300 = vector.shape_cast %296 : vector<8x128xf32> to vector<1x8x128xf32>
    tpu.vector_store %arg6[%c6, %c0_98, %c0_99], %300 {strides = array<i32>} : memref<8x8x128xf32, #tpu.memory_space<vmem>>, vector<1x8x128xf32>,
    %301 = vector.extract_strided_slice %28 {offsets = [56, 0], sizes = [8, 128], strides = [1, 1]} : vector<64x128xf32> to vector<8x128xf32>
    %cst_100 = arith.constant dense<0.000000e+00> : vector<8x128xf32>
    %302 = tpu.matmul %278, %5, %cst_100 {dimension_numbers = #tpu.dot_dimension_numbers<[1], [0], [0], [1], [0, 0, 1, 1], [], []>} : vector<8x128xbf16>, vector<128x128xbf16>, vector<8x128xf32> -> vector<8x128xf32>
    %303 = arith.addf %301, %302 : vector<8x128xf32>
    %304 = arith.negf %303 : vector<8x128xf32>
    %305 = math.exp %304 : vector<8x128xf32>
    %cst_101 = arith.constant 1.000000e+00 : f32
    %306 = vector.broadcast %cst_101 : f32 to vector<8x128xf32>
    %307 = arith.addf %306, %305 : vector<8x128xf32>
    %308 = arith.divf %306, %307 : vector<8x128xf32>
    %c64_i32_102 = arith.constant 64 : i32
    %309 = tpu.dynamic_rotate %308 by %c64_i32_102 dim 1 : vector<8x128xf32>, i32 -> vector<8x128xf32>
    %c32_i32_103 = arith.constant 32 : i32
    %310 = tpu.dynamic_rotate %308 by %c32_i32_103 dim 1 : vector<8x128xf32>, i32 -> vector<8x128xf32>
    %311 = arith.addf %302, %15 : vector<8x128xf32>
    %312 = arith.mulf %309, %311 : vector<8x128xf32>
    %313 = arith.addf %301, %312 : vector<8x128xf32>
    %314 = math.tanh %313 : vector<8x128xf32>
    %315 = arith.subf %277, %314 : vector<8x128xf32>
    %316 = arith.mulf %310, %315 : vector<8x128xf32>
    %317 = arith.addf %314, %316 : vector<8x128xf32>
    %318 = arith.truncf %317 : vector<8x128xf32> to vector<8x128xbf16>
    %cst_104 = arith.constant dense<0.000000e+00> : vector<8x128xf32>
    %319 = tpu.matmul %318, %3, %cst_104 {dimension_numbers = #tpu.dot_dimension_numbers<[1], [0], [0], [1], [0, 0, 1, 1], [], []>} : vector<8x128xbf16>, vector<128x128xbf16>, vector<8x128xf32> -> vector<8x128xf32>
    %320 = arith.addf %319, %11 : vector<8x128xf32>
    %cst_105 = arith.constant dense<0.000000e+00> : vector<8x128xf32>
    %321 = tpu.matmul %297, %7, %cst_105 {dimension_numbers = #tpu.dot_dimension_numbers<[1], [0], [0], [1], [0, 0, 1, 1], [], []>} : vector<8x128xbf16>, vector<128x128xbf16>, vector<8x128xf32> -> vector<8x128xf32>
    %322 = arith.addf %320, %321 : vector<8x128xf32>
    %323 = arith.negf %322 : vector<8x128xf32>
    %324 = math.exp %323 : vector<8x128xf32>
    %cst_106 = arith.constant 1.000000e+00 : f32
    %325 = vector.broadcast %cst_106 : f32 to vector<8x128xf32>
    %326 = arith.addf %325, %324 : vector<8x128xf32>
    %327 = arith.divf %325, %326 : vector<8x128xf32>
    %c64_i32_107 = arith.constant 64 : i32
    %328 = tpu.dynamic_rotate %327 by %c64_i32_107 dim 1 : vector<8x128xf32>, i32 -> vector<8x128xf32>
    %c32_i32_108 = arith.constant 32 : i32
    %329 = tpu.dynamic_rotate %327 by %c32_i32_108 dim 1 : vector<8x128xf32>, i32 -> vector<8x128xf32>
    %330 = arith.addf %321, %19 : vector<8x128xf32>
    %331 = arith.mulf %328, %330 : vector<8x128xf32>
    %332 = arith.addf %320, %331 : vector<8x128xf32>
    %333 = math.tanh %332 : vector<8x128xf32>
    %334 = arith.subf %296, %333 : vector<8x128xf32>
    %335 = arith.mulf %329, %334 : vector<8x128xf32>
    %336 = arith.addf %333, %335 : vector<8x128xf32>
    %c7 = arith.constant 7 : index
    %c0_109 = arith.constant 0 : index
    %c0_110 = arith.constant 0 : index
    %337 = vector.load %arg6[%c7, %c0_109, %c0_110] : memref<8x8x128xf32, #tpu.memory_space<vmem>>, vector<1x8x128xf32>
    %338 = vector.shape_cast %337 : vector<1x8x128xf32> to vector<8x128xf32>
    %339 = vector.shape_cast %336 : vector<8x128xf32> to vector<1x8x128xf32>
    tpu.vector_store %arg6[%c7, %c0_109, %c0_110], %339 {strides = array<i32>} : memref<8x8x128xf32, #tpu.memory_space<vmem>>, vector<1x8x128xf32>,
    return
  }
  func.func @transform_0(%arg0: i32) -> (i32, i32, i32) {
    %c0_i32 = arith.constant 0 : i32
    %c0_i32_0 = arith.constant 0 : i32
    %c0_i32_1 = arith.constant 0 : i32
    return %c0_i32, %arg0, %c0_i32_0 : i32, i32, i32
  }
  func.func @transform_1(%arg0: i32) -> (i32, i32, i32) {
    %c0_i32 = arith.constant 0 : i32
    %c0_i32_0 = arith.constant 0 : i32
    %c0_i32_1 = arith.constant 0 : i32
    %c0_i32_2 = arith.constant 0 : i32
    return %c0_i32, %c0_i32_0, %c0_i32_1 : i32, i32, i32
  }
  func.func @transform_2(%arg0: i32) -> (i32, i32, i32) {
    %c0_i32 = arith.constant 0 : i32
    %c0_i32_0 = arith.constant 0 : i32
    %c0_i32_1 = arith.constant 0 : i32
    %c0_i32_2 = arith.constant 0 : i32
    return %c0_i32, %c0_i32_0, %c0_i32_1 : i32, i32, i32
  }
  func.func @transform_3(%arg0: i32) -> (i32, i32, i32) {
    %c0_i32 = arith.constant 0 : i32
    %c0_i32_0 = arith.constant 0 : i32
    %c0_i32_1 = arith.constant 0 : i32
    %c0_i32_2 = arith.constant 0 : i32
    return %c0_i32, %c0_i32_0, %c0_i32_1 : i32, i32, i32
  }
  func.func @transform_4(%arg0: i32) -> (i32, i32, i32) {
    %c0_i32 = arith.constant 0 : i32
    %c0_i32_0 = arith.constant 0 : i32
    %c0_i32_1 = arith.constant 0 : i32
    %c0_i32_2 = arith.constant 0 : i32
    return %c0_i32, %c0_i32_0, %c0_i32_1 : i32, i32, i32
  }
  func.func @transform_5(%arg0: i32) -> (i32, i32, i32) {
    %c0_i32 = arith.constant 0 : i32
    %c0_i32_0 = arith.constant 0 : i32
    %c0_i32_1 = arith.constant 0 : i32
    return %c0_i32, %arg0, %c0_i32_0 : i32, i32, i32
  }
}

</mosaic_0001>

<bundles_post_ra>
// kernel: tpu_custom_call.1
= control target key start
LH: loop header
LB: loop body
LE: loop exit
PB: predicated region body
PF: predicated region fallthrough
CT: control target
= control target key end

     0   :  { %10 = vsyncpa [#allocation3], 0  ;;  %s3367_s0 = inlined_call_operand.hbm [shape: f32[8,8,128], index: 0, kind: input, shape index: {}]   ;;  %s3368_s1 = inlined_call_operand.hbm [shape: bf16[2,128,128], index: 1, kind: input, shape index: {}]   ;;  %s3369_s2 = inlined_call_operand.hbm [shape: bf16[2,128,128], index: 2, kind: input, shape index: {}]   ;;  %s3370_s3 = inlined_call_operand.vmem [shape: f32[2,1,128], index: 3, kind: input, shape index: {}]   ;;  %s3371_s4 = inlined_call_operand.vmem [shape: f32[2,1,128], index: 4, kind: input, shape index: {}]   ;;  %s3372_s5 = inlined_call_operand.hbm [shape: f32[8,8,128], index: 5, kind: output, shape index: {}]  }
   0x1   :  { %11 = vsyncpa [#allocation6], 0 }
   0x2   :  { %12 = vsyncpa [#allocation4], 0  ;;  %s2619_s18 = smov [#allocation5]  }
   0x3   :  { %s30_s19 = sshll.u32 %s2619_s18, 4  ;;  %s31_s19 = int_to_ptr.vmem [resolvable:$true] %s30_s19 }
   0x4   :  { %s2541_s20 = scalar_lea.vmem %s31_s19, 2048  ;;  %p2546_p1 = scmp.lt.s32.totalorder %s31_s19, %s31_s19 }
   0x5   :  { %p2542_p0 = scmp.ne.s32.totalorder %s31_s19, %s2541_s20  ;;  %p2547_p2 = scmp.lt.s32.totalorder %s2541_s20, %s2541_s20 }
   0x7   :  { %p2548_p3 = por %p2547_p2, %p2546_p1 }
   0x9   :  { %p2549_p4 = pnand %p2548_p3, %p2542_p0 }
   0xb   :  { %2552 = shalt.err (!%p2549_p4)
}
   0xc   :  { %s2620_s21 = smov 64   ;;  %s2621_s22 = smov 4  }
   0xd   :  { %36 = dma.hbm_to_vmem [thread:$0]  %s3368_s1, 2048, %s31_s19, [#allocation6], %s2620_s21, %s2620_s21, %s2621_s22  }
   0xe   :  { %s2622_s25 = smov [#allocation2]  }
   0xf   :  { %s18_s26 = sshll.u32 %s2622_s25, 4  ;;  %s19_s26 = int_to_ptr.vmem [resolvable:$true] %s18_s26 }
  0x10   :  { %s2561_s27 = scalar_lea.vmem %s19_s26, 1024  ;;  %p2566_p6 = scmp.lt.s32.totalorder %s19_s26, %s19_s26 }
  0x11   :  { %p2562_p5 = scmp.ne.s32.totalorder %s19_s26, %s2561_s27  ;;  %p2567_p7 = scmp.lt.s32.totalorder %s2561_s27, %s2561_s27 }
  0x13   :  { %p2568_p8 = por %p2567_p7, %p2566_p6 }
  0x15   :  { %p2569_p9 = pnand %p2568_p8, %p2562_p5 }
  0x17   :  { %2572 = shalt.err (!%p2569_p9)
}
  0x18   :  { %s2623_s28 = smov 128   ;;  %s2624_s29 = smov 8  }
  0x19   :  { %24 = dma.hbm_to_vmem [thread:$0]  %s3367_s0, 1024, %s19_s26, [#allocation3], %s2623_s28, %s2623_s28, %s2624_s29  }
  0x1a   :  { %s2625_s1 = smov [#allocation7]  }
  0x1b   :  { %s42_s7 = sshll.u32 %s2625_s1, 4  ;;  %s43_s7 = int_to_ptr.vmem [resolvable:$true] %s42_s7 }
  0x1c   :  { %s2581_s8 = scalar_lea.vmem %s43_s7, 2048  ;;  %p2586_p11 = scmp.lt.s32.totalorder %s43_s7, %s43_s7 }
  0x1d   :  { %p2582_p10 = scmp.ne.s32.totalorder %s43_s7, %s2581_s8  ;;  %p2587_p12 = scmp.lt.s32.totalorder %s2581_s8, %s2581_s8 }
  0x1f   :  { %p2588_p13 = por %p2587_p12, %p2586_p11 }
  0x21   :  { %p2589_p0 = pnand %p2588_p13, %p2582_p10 }
  0x23   :  { %2592 = shalt.err (!%p2589_p0)
}
  0x24   :  { %48 = dma.hbm_to_vmem [thread:$0]  %s3369_s2, 2048, %s43_s7, [#allocation6], %s2620_s21, %s2620_s21, %s2621_s22  }
  0x25   :  { %2613 = dma.done.wait [#allocation3], 1024  }
  0x26   :  { %2614 = vsyncadd [#allocation3], 4294966272 }
  0x27   :  { %2615 = dma.done.wait [#allocation6], 4096  }
  0x28   :  { %2616 = vsyncadd [#allocation6], 4294963200  ;;  %v2377_v0 = vld [vmem:[#allocation5 + $0x38] sm:$0xff]   ;;  %v2378_v1 = vld [vmem:[#allocation5 + $0x30] sm:$0xff]   ;;  %v2626_v16 = vmov 0.0   ;;  %s2627_s11 = smov 32  }
  0x29   :  { %1902 = vmatprep.subr.bf16.mxu0 %v2377_v0  ;;  %v2379_v2 = vld [vmem:[#allocation5 + $0x28] sm:$0xff]   ;;  %v2380_v3 = vld [vmem:[#allocation5 + $0x20] sm:$0xff]   ;;  %v2381_v7 = vld [vmem:[#allocation5 + $0x18] sm:$0xff]   ;;  %1926 = vmatprep.subr.bf16.mxu1 %v2626_v16  ;;  %vm2628_vm0 = vmmov 0  }
  0x2a   :  { %1903 = vmatpush3.bf16.msra.mxu0 %v2377_v0  ;;  %v152_v4 = vld [vmem:[#allocation2] sm:$0xff]  ;;  %v153_v5 = vld [vmem:[#allocation2 + $0x8] sm:$0xff]  ;;  %v2382_v8 = vld [vmem:[#allocation5 + $0x10] sm:$0xff]   ;;  %1942 = vmatprep.mubr.msk.bf16.mxu1 %vm2628_vm0, %v2626_v16 }
  0x2b   :  { %1904 = vmatprep.subr.bf16.mxu0 %v2378_v1  ;;  %v160_v6 = vpack.c.bf16 %v153_v5, %v152_v4  ;;  %v2383_v9 = vld [vmem:[#allocation5 + $0x8] sm:$0xff]   ;;  %v2384_v10 = vld [vmem:[#allocation5] sm:$0xff]   ;;  %v154_v11 = vld [vmem:[#allocation2 + $0x10] sm:$0xff] }
  0x2c   :  { %v155_v12 = vld [vmem:[#allocation2 + $0x18] sm:$0xff]  ;;  %v2684_v17 = vld [vmem:[#allocation5 + $0x70] sm:$0xff]   ;;  %v2699_v20 = vld [vmem:[%s3370_s3] ss:$0 sm:$0xff] }
  0x2d   :  { %1918 = vmatprep.mubr.bf16.mxu0 %v160_v6  ;;  %v161_v13 = vpack.c.bf16 %v155_v12, %v154_v11  ;;  %v2676_v14 = vld [vmem:[#allocation5 + $0x78] sm:$0xff]   ;;  %v2686_v18 = vld [vmem:[#allocation7 + $0x30] sm:$0xff]   ;;  %v2702_v26 = vld [vmem:[#allocation5 + $0x68] sm:$0xff]  }
  0x2e   :  { %1905 = vmatpush3.bf16.msra.mxu0 %v2378_v1  ;;  %v2678_v15 = vld [vmem:[#allocation7 + $0x38] sm:$0xff]   ;;  %1927 = vmatpush3.bf16.msra.mxu1 %v2676_v14  ;;  %v2704_v27 = vld [vmem:[#allocation7 + $0x28] sm:$0xff]   ;;  %v2710_v28 = vld [vmem:[#allocation5 + $0x60] sm:$0xff]  }
  0x2f   :  { %1906 = vmatprep.subr.bf16.mxu0 %v2379_v2  ;;  %1928 = vmatprep.subr.bf16.mxu1 %v2626_v16  ;;  %v2712_v29 = vld [vmem:[#allocation7 + $0x20] sm:$0xff]   ;;  %v157_v31 = vld [vmem:[#allocation2 + $0x28] sm:$0xff]  ;;  %v2718_v33 = vld [vmem:[#allocation5 + $0x58] sm:$0xff]  }
  0x30   :  { %v156_v30 = vld [vmem:[#allocation2 + $0x20] sm:$0xff]  ;;  %v2720_v34 = vld [vmem:[#allocation7 + $0x18] sm:$0xff]   ;;  %v158_v35 = vld [vmem:[#allocation2 + $0x30] sm:$0xff] }
  0x31   :  { %v162_v32 = vpack.c.bf16 %v157_v31, %v156_v30  ;;  %v159_v36 = vld [vmem:[#allocation2 + $0x38] sm:$0xff]  ;;  %v2726_v38 = vld [vmem:[#allocation5 + $0x50] sm:$0xff]   ;;  %v2735_v41 = vld [vmem:[#allocation5 + $0x48] sm:$0xff]  }
  0x32   :  { %1907 = vmatpush3.bf16.msra.mxu0 %v2379_v2  ;;  %1929 = vmatpush3.bf16.msra.mxu1 %v2684_v17  ;;  %v163_v37 = vpack.c.bf16 %v159_v36, %v158_v35  ;;  %v2728_v39 = vld [vmem:[#allocation7 + $0x10] sm:$0xff]   ;;  %v2737_v42 = vld [vmem:[#allocation7 + $0x8] sm:$0xff]   ;;  %v2744_v43 = vld [vmem:[#allocation5 + $0x40] sm:$0xff]  }
  0x33   :  { %1908 = vmatprep.subr.bf16.mxu0 %v2380_v3  ;;  %1930 = vmatprep.subr.bf16.mxu1 %v2626_v16  ;;  %v2746_v44 = vld [vmem:[#allocation7] sm:$0xff]   ;;  %v2786_v54 = vld [vmem:[#allocation7 + $0x78] sm:$0xff]   ;;  %v2789_v55 = vld [vmem:[#allocation7 + $0x70] sm:$0xff]  }
  0x34   :  { %v2759_v45 = vld [vmem:[%s3371_s4] ss:$0 sm:$0xff]  ;;  %v2807_v62 = vld [vmem:[%s3370_s3 + $0x1] ss:$0 sm:$0xff]  ;;  %v2823_v31 = vld [vmem:[#allocation7 + $0x50] sm:$0xff]  }
  0x35   :  { %v2829_v35 = vld [vmem:[#allocation7 + $0x48] sm:$0xff]   ;;  %v2834_v36 = vld [vmem:[#allocation7 + $0x40] sm:$0xff]  }
  0x36   :  { %1909 = vmatpush3.bf16.msra.mxu0 %v2380_v3  ;;  %1931 = vmatpush3.bf16.msra.mxu1 %v2702_v26 }
  0x37   :  { %1910 = vmatprep.subr.bf16.mxu0 %v2381_v7  ;;  %1932 = vmatprep.subr.bf16.mxu1 %v2626_v16 }
  0x3a   :  { %1911 = vmatpush3.bf16.msra.mxu0 %v2381_v7  ;;  %1933 = vmatpush3.bf16.msra.mxu1 %v2710_v28 }
  0x3b   :  { %1912 = vmatprep.subr.bf16.mxu0 %v2382_v8  ;;  %1934 = vmatprep.subr.bf16.mxu1 %v2626_v16 }
  0x3e   :  { %1913 = vmatpush3.bf16.msra.mxu0 %v2382_v8  ;;  %1935 = vmatpush3.bf16.msra.mxu1 %v2718_v33 }
  0x3f   :  { %1914 = vmatprep.subr.bf16.mxu0 %v2383_v9  ;;  %1936 = vmatprep.subr.bf16.mxu1 %v2626_v16 }
  0x42   :  { %1915 = vmatpush3.bf16.msra.mxu0 %v2383_v9  ;;  %1937 = vmatpush3.bf16.msra.mxu1 %v2726_v38 }
  0x43   :  { %1916 = vmatprep.subr.bf16.mxu0 %v2384_v10  ;;  %1938 = vmatprep.subr.bf16.mxu1 %v2626_v16 }
  0x46   :  { %1917 = vmatpush3.bf16.msra.mxu0 %v2384_v10  ;;  %1939 = vmatpush3.bf16.msra.mxu1 %v2735_v41 }
  0x47   :  { %1946 = vmatprep.subr.bf16.mxu0 %v2626_v16  ;;  %1940 = vmatprep.subr.bf16.mxu1 %v2626_v16 }
  0x49   :  { %1919 = vmatmul.mubr.bf16.vlgmr.msra.gmra.mxu0 %v161_v13 }
  0x4a   :  { %1947 = vmatpush3.bf16.msra.mxu0 %v2678_v15  ;;  %1922 = vmatprep.mubr.bf16.mxu0 %v162_v32 }
  0x4b   :  { %1948 = vmatprep.subr.bf16.mxu0 %v2626_v16  ;;  %1941 = vmatpush3.bf16.msra.mxu1 %v2744_v43 }
  0x4c   :  { %1966 = vmatprep.subr.bf16.mxu1 %v2626_v16 }
  0x4e   :  { %1949 = vmatpush3.bf16.msra.mxu0 %v2686_v18 }
  0x4f   :  { %1950 = vmatprep.subr.bf16.mxu0 %v2626_v16 }
  0x51   :  { %1923 = vmatmul.mubr.bf16.gmra.mxu0 %v163_v37  ;;  %v2842_v37 = vld [vmem:[%s3371_s4 + $0x1] ss:$0 sm:$0xff] }
  0x52   :  { %1951 = vmatpush3.bf16.msra.mxu0 %v2704_v27  ;;  %1962 = vmatprep.mubr.msk.bf16.mxu0 %vm2628_vm0, %v2626_v16 }
  0x53   :  { %1952 = vmatprep.subr.bf16.mxu0 %v2626_v16 }
  0x56   :  { %1953 = vmatpush3.bf16.msra.mxu0 %v2712_v29 }
  0x57   :  { %1954 = vmatprep.subr.bf16.mxu0 %v2626_v16 }
  0x5a   :  { %1955 = vmatpush3.bf16.msra.mxu0 %v2720_v34 }
  0x5b   :  { %1956 = vmatprep.subr.bf16.mxu0 %v2626_v16 }
  0x5e   :  { %1957 = vmatpush3.bf16.msra.mxu0 %v2728_v39 }
  0x5f   :  { %1958 = vmatprep.subr.bf16.mxu0 %v2626_v16 }
  0x62   :  { %1959 = vmatpush3.bf16.msra.mxu0 %v2737_v42 }
  0x63   :  { %1960 = vmatprep.subr.bf16.mxu0 %v2626_v16 }
  0x66   :  { %1961 = vmatpush3.bf16.msra.mxu0 %v2746_v44 }
  0x67   :  { %1986 = vmatprep.subr.bf16.mxu0 %v2626_v16 }
 0x109   :  { %v2694_v19 = vpop.f32.mrf.mxu0 }
 0x10b   :  { %v253_v21 = vpop.f32.mrf.mxu0 }
 0x10c   :  { %v254_v22 = vadd.f32 %v2699_v20, %v253_v21 }
 0x10d   :  { %v2794_v56 = vpop.f32.mrf.mxu0 }
 0x10e   :  { %v1652_v23 = vmul.f32 -1.442695, %v254_v22 }
 0x10f   :  { %v256_v57 = vpop.f32.mrf.mxu0 }
 0x110   :  { %2409 = vpow2.f32 %v1652_v23  ;;  %v257_v63 = vadd.f32 %v2699_v20, %v256_v57  ;;  %v2811_v23 = vld [vmem:[#allocation7 + $0x68] sm:$0xff]  }
 0x111   :  { %v2796_v58 = vpop.f32.mrf.mxu0 }
 0x113   :  { %v2798_v59 = vpop.f32.mrf.mxu0 }
 0x115   :  { %v2800_v60 = vpop.f32.mrf.mxu0 }
 0x117   :  { %v2802_v61 = vpop.f32.mrf.mxu0 }
 0x11d   :  { %v2410_v24 = vpop.eup %2409 }
 0x11e   :  { %v287_v25 = vadd.f32 1.0, %v2410_v24  ;;  %v2815_v24 = vld [vmem:[#allocation7 + $0x60] sm:$0xff]  }
 0x120   :  { %2411 = vrcp.f32 %v287_v25  ;;  %v2819_v25 = vld [vmem:[#allocation7 + $0x58] sm:$0xff]  }
 0x12d   :  { %v2412_v40 = vpop.eup %2411 }
 0x12e   :  { %290 = vrot.lane.b32.xlu0 %v2412_v40, %s2620_s21 }
 0x132   :  { %292 = vrot.lane.b32.xlu0 %v2412_v40, %s2627_s11 }
 0x1a0   :  { %v291_v46 = vpop.permute.xlu0 %290 }
 0x1a1   :  { %v294_v47 = vmul.f32 %v2759_v45, %v291_v46 }
 0x1a3   :  { %v295_v48 = vadd.f32 %v294_v47, %v254_v22 }
 0x1a4   :  { %v293_v50 = vpop.permute.xlu0 %292 }
 0x1a5   :  { %2413 = vtanh.f32 %v295_v48 }
 0x1b2   :  { %v2414_v49 = vpop.eup %2413 }
 0x1b3   :  { %v297_v51 = vmul.f32 %v2414_v49, %v293_v50 }
 0x1b5   :  { %v2762_v52 = vsub.f32 %v2414_v49, %v297_v51 }
 0x1b7   :  { %v299_v53 = vpack.c.bf16 %v2762_v52, %v2762_v52 }
 0x1b9   :  { %1943 = vmatmul.mubr.bf16.vlgmr.msra.gmra.mxu1 %v299_v53  ;;  %1963 = vmatmul.mubr.bf16.vlgmr.msra.gmra.mxu0 %v299_v53 }
 0x1ba   :  { %1967 = vmatpush3.bf16.msra.mxu1 %v2676_v14  ;;  %2002 = vmatprep.mubr.msk.bf16.mxu0 %vm2628_vm0, %v2626_v16 }
 0x1bb   :  { %1968 = vmatprep.subr.bf16.mxu1 %v2626_v16  ;;  %1982 = vmatprep.mubr.msk.bf16.mxu1 %vm2628_vm0, %v2626_v16 }
 0x1bc   :  { %1987 = vmatpush3.bf16.msra.mxu0 %v2786_v54 }
 0x1bd   :  { %1988 = vmatprep.subr.bf16.mxu0 %v2626_v16 }
 0x1be   :  { %1969 = vmatpush3.bf16.msra.mxu1 %v2684_v17 }
 0x1bf   :  { %1970 = vmatprep.subr.bf16.mxu1 %v2626_v16 }
 0x1c0   :  { %1989 = vmatpush3.bf16.msra.mxu0 %v2789_v55 }
 0x1c1   :  { %1990 = vmatprep.subr.bf16.mxu0 %v2626_v16 }
 0x1c2   :  { %1971 = vmatpush3.bf16.msra.mxu1 %v2702_v26 }
 0x1c3   :  { %1972 = vmatprep.subr.bf16.mxu1 %v2626_v16 }
 0x1c4   :  { %1991 = vmatpush3.bf16.msra.mxu0 %v2811_v23 }
 0x1c5   :  { %1992 = vmatprep.subr.bf16.mxu0 %v2626_v16 }
 0x1c6   :  { %1973 = vmatpush3.bf16.msra.mxu1 %v2710_v28 }
 0x1c7   :  { %1974 = vmatprep.subr.bf16.mxu1 %v2626_v16 }
 0x1c8   :  { %1993 = vmatpush3.bf16.msra.mxu0 %v2815_v24 }
 0x1c9   :  { %1994 = vmatprep.subr.bf16.mxu0 %v2626_v16 }
 0x1ca   :  { %1975 = vmatpush3.bf16.msra.mxu1 %v2718_v33 }
 0x1cb   :  { %1976 = vmatprep.subr.bf16.mxu1 %v2626_v16 }
 0x1cc   :  { %1995 = vmatpush3.bf16.msra.mxu0 %v2819_v25 }
 0x1cd   :  { %1996 = vmatprep.subr.bf16.mxu0 %v2626_v16 }
 0x1ce   :  { %1977 = vmatpush3.bf16.msra.mxu1 %v2726_v38 }
 0x1cf   :  { %1978 = vmatprep.subr.bf16.mxu1 %v2626_v16 }
 0x1d0   :  { %1997 = vmatpush3.bf16.msra.mxu0 %v2823_v31 }
 0x1d1   :  { %1998 = vmatprep.subr.bf16.mxu0 %v2626_v16 }
 0x1d2   :  { %1979 = vmatpush3.bf16.msra.mxu1 %v2735_v41 }
 0x1d3   :  { %1980 = vmatprep.subr.bf16.mxu1 %v2626_v16 }
 0x1d4   :  { %1999 = vmatpush3.bf16.msra.mxu0 %v2829_v35 }
 0x1d5   :  { %2000 = vmatprep.subr.bf16.mxu0 %v2626_v16 }
 0x1d6   :  { %1981 = vmatpush3.bf16.msra.mxu1 %v2744_v43 }
 0x1d7   :  { %2006 = vmatprep.subr.bf16.mxu1 %v2626_v16 }
 0x1d8   :  { %2001 = vmatpush3.bf16.msra.mxu0 %v2834_v36 }
 0x1d9   :  { %2026 = vmatprep.subr.bf16.mxu0 %v2626_v16 }
 0x279   :  { %v382_v0 = vpop.f32.mrf.mxu1  ;;  %v487_v1 = vpop.f32.mrf.mxu0 }
 0x27a   :  { %v383_v2 = vadd.f32 %v2807_v62, %v382_v0  ;;  %v493_v3 = vadd.f32 %v487_v1, %v257_v63  ;;  %v504_v40 = vadd.f32 %v2759_v45, %v487_v1 }
 0x27b   :  { %v1944_v4 = vpop.f32.mrf.mxu1  ;;  %v1964_v5 = vpop.f32.mrf.mxu0 }
 0x27c   :  { %v1661_v6 = vmul.f32 -1.442695, %v383_v2  ;;  %v1670_v7 = vmul.f32 -1.442695, %v493_v3 }
 0x27d   :  { %v385_v8 = vpop.f32.mrf.mxu1  ;;  %v490_v9 = vpop.f32.mrf.mxu0 }
 0x27e   :  { %2415 = vpow2.f32 %v1661_v6 }
 0x27f   :  { %2417 = vpow2.f32 %v1670_v7  ;;  %v1945_v10 = vpop.f32.mrf.mxu1  ;;  %v1965_v11 = vpop.f32.mrf.mxu0 }
 0x28b   :  { %v2416_v12 = vpop.eup %2415 }
 0x28c   :  { %v2418_v13 = vpop.eup %2417  ;;  %v391_v21 = vadd.f32 1.0, %v2416_v12 }
 0x28d   :  { %v497_v22 = vadd.f32 1.0, %v2418_v13 }
 0x28e   :  { %2419 = vrcp.f32 %v391_v21 }
 0x28f   :  { %2421 = vrcp.f32 %v497_v22 }
 0x29b   :  { %v2420_v30 = vpop.eup %2419 }
 0x29c   :  { %v2422_v32 = vpop.eup %2421  ;;  %394 = vrot.lane.b32.xlu0 %v2420_v30, %s2620_s21 }
 0x29d   :  { %500 = vrot.lane.b32.xlu1 %v2422_v32, %s2620_s21 }
 0x2a1   :  { %502 = vrot.lane.b32.xlu1 %v2422_v32, %s2627_s11  ;;  %v262_v32 = vadd.f32 %v2694_v19, %v2699_v20 }
 0x2a5   :  { %396 = vrot.lane.b32.xlu1 %v2420_v30, %s2627_s11 }
 0x30e   :  { %v395_v46 = vpop.permute.xlu0 %394 }
 0x30f   :  { %v501_v47 = vpop.permute.xlu1 %500  ;;  %v398_v48 = vmul.f32 %v2842_v37, %v395_v46 }
 0x310   :  { %v505_v49 = vmul.f32 %v504_v40, %v501_v47 }
 0x311   :  { %v399_v50 = vadd.f32 %v398_v48, %v383_v2 }
 0x312   :  { %v506_v51 = vadd.f32 %v505_v49, %v257_v63 }
 0x313   :  { %2423 = vtanh.f32 %v399_v50  ;;  %v503_v53 = vpop.permute.xlu1 %502 }
 0x314   :  { %2425 = vtanh.f32 %v506_v51 }
 0x317   :  { %v397_v0 = vpop.permute.xlu1 %396 }
 0x320   :  { %v2424_v57 = vpop.eup %2423 }
 0x321   :  { %v2426_v3 = vpop.eup %2425  ;;  %v401_v4 = vmul.f32 %v2424_v57, %v397_v0 }
 0x322   :  { %v508_v5 = vsub.f32 %v2762_v52, %v2426_v3 }
 0x323   :  { %v2847_v6 = vsub.f32 %v2424_v57, %v401_v4 }
 0x324   :  { %v509_v7 = vmul.f32 %v508_v5, %v503_v53 }
 0x325   :  { %v403_v1 = vpack.c.bf16 %v2847_v6, %v2847_v6  ;;  %404 = vst [vmem:[#allocation8] sm:$0xff] %v2847_v6 }
 0x326   :  { %v2852_v8 = vadd.f32 %v2426_v3, %v509_v7 }
 0x327   :  { %2003 = vmatmul.mubr.bf16.vlgmr.msra.gmra.mxu0 %v403_v1 }
 0x328   :  { %v511_v63 = vpack.c.bf16 %v2852_v8, %v2852_v8  ;;  %2027 = vmatpush3.bf16.msra.mxu0 %v2676_v14  ;;  %2042 = vmatprep.mubr.msk.bf16.mxu0 %vm2628_vm0, %v2626_v16 }
 0x329   :  { %2028 = vmatprep.subr.bf16.mxu0 %v2626_v16 }
 0x32a   :  { %1983 = vmatmul.mubr.bf16.vlgmr.msra.gmra.mxu1 %v511_v63 }
 0x32b   :  { %2007 = vmatpush3.bf16.msra.mxu1 %v2678_v15  ;;  %2022 = vmatprep.mubr.msk.bf16.mxu1 %vm2628_vm0, %v2626_v16 }
 0x32c   :  { %2008 = vmatprep.subr.bf16.mxu1 %v2626_v16  ;;  %2029 = vmatpush3.bf16.msra.mxu0 %v2684_v17 }
 0x32d   :  { %2030 = vmatprep.subr.bf16.mxu0 %v2626_v16 }
 0x32f   :  { %2009 = vmatpush3.bf16.msra.mxu1 %v2686_v18 }
 0x330   :  { %2010 = vmatprep.subr.bf16.mxu1 %v2626_v16  ;;  %2031 = vmatpush3.bf16.msra.mxu0 %v2702_v26 }
 0x331   :  { %2032 = vmatprep.subr.bf16.mxu0 %v2626_v16 }
 0x333   :  { %2011 = vmatpush3.bf16.msra.mxu1 %v2704_v27 }
 0x334   :  { %2012 = vmatprep.subr.bf16.mxu1 %v2626_v16  ;;  %2033 = vmatpush3.bf16.msra.mxu0 %v2710_v28 }
 0x335   :  { %2034 = vmatprep.subr.bf16.mxu0 %v2626_v16 }
 0x337   :  { %2013 = vmatpush3.bf16.msra.mxu1 %v2712_v29 }
 0x338   :  { %2014 = vmatprep.subr.bf16.mxu1 %v2626_v16  ;;  %2035 = vmatpush3.bf16.msra.mxu0 %v2718_v33 }
 0x339   :  { %2036 = vmatprep.subr.bf16.mxu0 %v2626_v16 }
 0x33b   :  { %2015 = vmatpush3.bf16.msra.mxu1 %v2720_v34 }
 0x33c   :  { %2016 = vmatprep.subr.bf16.mxu1 %v2626_v16  ;;  %2037 = vmatpush3.bf16.msra.mxu0 %v2726_v38 }
 0x33d   :  { %2038 = vmatprep.subr.bf16.mxu0 %v2626_v16 }
 0x33f   :  { %2017 = vmatpush3.bf16.msra.mxu1 %v2728_v39 }
 0x340   :  { %2018 = vmatprep.subr.bf16.mxu1 %v2626_v16  ;;  %2039 = vmatpush3.bf16.msra.mxu0 %v2735_v41 }
 0x341   :  { %2040 = vmatprep.subr.bf16.mxu0 %v2626_v16 }
 0x343   :  { %2019 = vmatpush3.bf16.msra.mxu1 %v2737_v42 }
 0x344   :  { %2020 = vmatprep.subr.bf16.mxu1 %v2626_v16  ;;  %2041 = vmatpush3.bf16.msra.mxu0 %v2744_v43 }
 0x345   :  { %2066 = vmatprep.subr.bf16.mxu0 %v2626_v16 }
 0x347   :  { %2021 = vmatpush3.bf16.msra.mxu1 %v2746_v44 }
 0x348   :  { %2046 = vmatprep.subr.bf16.mxu1 %v2626_v16 }
 0x34a   :  { %2023 = vmatmul.mubr.bf16.vlgmr.msra.gmra.mxu1 %v511_v63 }
 0x34b   :  { %2047 = vmatpush3.bf16.msra.mxu1 %v2786_v54  ;;  %2062 = vmatprep.mubr.msk.bf16.mxu1 %vm2628_vm0, %v2626_v16 }
 0x34c   :  { %2048 = vmatprep.subr.bf16.mxu1 %v2626_v16 }
 0x34f   :  { %2049 = vmatpush3.bf16.msra.mxu1 %v2789_v55 }
 0x350   :  { %2050 = vmatprep.subr.bf16.mxu1 %v2626_v16 }
 0x353   :  { %2051 = vmatpush3.bf16.msra.mxu1 %v2811_v23 }
 0x354   :  { %2052 = vmatprep.subr.bf16.mxu1 %v2626_v16 }
 0x357   :  { %2053 = vmatpush3.bf16.msra.mxu1 %v2815_v24 }
 0x358   :  { %2054 = vmatprep.subr.bf16.mxu1 %v2626_v16 }
 0x35b   :  { %2055 = vmatpush3.bf16.msra.mxu1 %v2819_v25 }
 0x35c   :  { %2056 = vmatprep.subr.bf16.mxu1 %v2626_v16 }
 0x35f   :  { %2057 = vmatpush3.bf16.msra.mxu1 %v2823_v31 }
 0x360   :  { %2058 = vmatprep.subr.bf16.mxu1 %v2626_v16 }
 0x363   :  { %2059 = vmatpush3.bf16.msra.mxu1 %v2829_v35 }
 0x364   :  { %2060 = vmatprep.subr.bf16.mxu1 %v2626_v16 }
 0x367   :  { %2061 = vmatpush3.bf16.msra.mxu1 %v2834_v36 }
 0x368   :  { %2086 = vmatprep.subr.bf16.mxu1 %v2626_v16 }
 0x3e7   :  { %v634_v52 = vpop.f32.mrf.mxu0 }
 0x3e8   :  { %v651_v63 = vadd.f32 %v2842_v37, %v634_v52 }
 0x3e9   :  { %v2004_v2 = vpop.f32.mrf.mxu0 }
 0x3ea   :  { %v546_v9 = vpop.f32.mrf.mxu1 }
 0x3eb   :  { %v637_v10 = vpop.f32.mrf.mxu0  ;;  %v547_v22 = vadd.f32 %v2807_v62, %v546_v9 }
 0x3ec   :  { %v1984_v11 = vpop.f32.mrf.mxu1 }
 0x3ed   :  { %v2005_v12 = vpop.f32.mrf.mxu0  ;;  %v640_v30 = vadd.f32 %v634_v52, %v547_v22 }
 0x3ee   :  { %v549_v13 = vpop.f32.mrf.mxu1 }
 0x3ef   :  { %v1679_v40 = vmul.f32 -1.442695, %v640_v30 }
 0x3f0   :  { %v1985_v21 = vpop.f32.mrf.mxu1 }
 0x3f1   :  { %2427 = vpow2.f32 %v1679_v40 }
 0x3fe   :  { %v2428_v53 = vpop.eup %2427 }
 0x3ff   :  { %v644_v3 = vadd.f32 1.0, %v2428_v53 }
 0x40a   :  { %v695_v46 = vpop.f32.mrf.mxu1 }
 0x40b   :  { %v701_v47 = vadd.f32 %v695_v46, %v262_v32  ;;  %v712_v5 = vadd.f32 %v2759_v45, %v695_v46 }
 0x40c   :  { %v2024_v48 = vpop.f32.mrf.mxu1 }
 0x40d   :  { %v1680_v49 = vmul.f32 -1.442695, %v701_v47 }
 0x40e   :  { %v698_v50 = vpop.f32.mrf.mxu1 }
 0x40f   :  { %2429 = vpow2.f32 %v1680_v49 }
 0x410   :  { %v2025_v51 = vpop.f32.mrf.mxu1 }
 0x41c   :  { %v2430_v57 = vpop.eup %2429 }
 0x41d   :  { %v705_v0 = vadd.f32 1.0, %v2430_v57 }
 0x41f   :  { %2431 = vrcp.f32 %v705_v0 }
 0x420   :  { %2433 = vrcp.f32 %v644_v3 }
 0x42c   :  { %v2432_v4 = vpop.eup %2431 }
 0x42d   :  { %710 = vrot.lane.b32.xlu1 %v2432_v4, %s2627_s11  ;;  %708 = vrot.lane.b32.xlu0 %v2432_v4, %s2620_s21  ;;  %v2434_v19 = vpop.eup %2433 }
 0x431   :  { %649 = vrot.lane.b32.xlu1 %v2434_v19, %s2627_s11  ;;  %647 = vrot.lane.b32.xlu0 %v2434_v19, %s2620_s21 }
 0x49f   :  { %v709_v7 = vpop.permute.xlu0 %708  ;;  %v711_v13 = vpop.permute.xlu1 %710 }
 0x4a0   :  { %v713_v1 = vmul.f32 %v712_v5, %v709_v7  ;;  %v265_v5 = vadd.f32 %v2794_v56, %v2699_v20 }
 0x4a2   :  { %v714_v2 = vadd.f32 %v713_v1, %v262_v32 }
 0x4a3   :  { %v648_v9 = vpop.permute.xlu0 %647  ;;  %v650_v48 = vpop.permute.xlu1 %649 }
 0x4a4   :  { %2435 = vtanh.f32 %v714_v2  ;;  %v652_v10 = vmul.f32 %v651_v63, %v648_v9 }
 0x4a6   :  { %v653_v11 = vadd.f32 %v652_v10, %v547_v22 }
 0x4a8   :  { %2437 = vtanh.f32 %v653_v11 }
 0x4b1   :  { %v2436_v12 = vpop.eup %2435 }
 0x4b2   :  { %v716_v21 = vsub.f32 %v2852_v8, %v2436_v12 }
 0x4b4   :  { %v717_v30 = vmul.f32 %v716_v21, %v711_v13 }
 0x4b5   :  { %v2438_v40 = vpop.eup %2437 }
 0x4b6   :  { %v2920_v47 = vadd.f32 %v2436_v12, %v717_v30  ;;  %v655_v46 = vsub.f32 %v2847_v6, %v2438_v40 }
 0x4b8   :  { %v719_v52 = vpack.c.bf16 %v2920_v47, %v2920_v47  ;;  %v656_v32 = vmul.f32 %v655_v46, %v650_v48 }
 0x4ba   :  { %2043 = vmatmul.mubr.bf16.vlgmr.msra.gmra.mxu0 %v719_v52  ;;  %v2925_v49 = vadd.f32 %v2438_v40, %v656_v32 }
 0x4bb   :  { %2067 = vmatpush3.bf16.msra.mxu0 %v2678_v15  ;;  %2082 = vmatprep.mubr.msk.bf16.mxu0 %vm2628_vm0, %v2626_v16 }
 0x4bc   :  { %2068 = vmatprep.subr.bf16.mxu0 %v2626_v16  ;;  %v658_v8 = vpack.c.bf16 %v2925_v49, %v2925_v49  ;;  %660 = vst [vmem:[#allocation8 + $0x8] sm:$0xff] %v2925_v49 }
 0x4be   :  { %2063 = vmatmul.mubr.bf16.vlgmr.msra.gmra.mxu1 %v658_v8 }
 0x4bf   :  { %2069 = vmatpush3.bf16.msra.mxu0 %v2686_v18  ;;  %2087 = vmatpush3.bf16.msra.mxu1 %v2676_v14 }
 0x4c0   :  { %2070 = vmatprep.subr.bf16.mxu0 %v2626_v16  ;;  %2088 = vmatprep.subr.bf16.mxu1 %v2626_v16 }
 0x4c1   :  { %2102 = vmatprep.mubr.msk.bf16.mxu1 %vm2628_vm0, %v2626_v16 }
 0x4c3   :  { %2071 = vmatpush3.bf16.msra.mxu0 %v2704_v27  ;;  %2089 = vmatpush3.bf16.msra.mxu1 %v2684_v17 }
 0x4c4   :  { %2072 = vmatprep.subr.bf16.mxu0 %v2626_v16  ;;  %2090 = vmatprep.subr.bf16.mxu1 %v2626_v16 }
 0x4c7   :  { %2073 = vmatpush3.bf16.msra.mxu0 %v2712_v29  ;;  %2091 = vmatpush3.bf16.msra.mxu1 %v2702_v26 }
 0x4c8   :  { %2074 = vmatprep.subr.bf16.mxu0 %v2626_v16  ;;  %2092 = vmatprep.subr.bf16.mxu1 %v2626_v16 }
 0x4cb   :  { %2075 = vmatpush3.bf16.msra.mxu0 %v2720_v34  ;;  %2093 = vmatpush3.bf16.msra.mxu1 %v2710_v28 }
 0x4cc   :  { %2076 = vmatprep.subr.bf16.mxu0 %v2626_v16  ;;  %2094 = vmatprep.subr.bf16.mxu1 %v2626_v16 }
 0x4cf   :  { %2077 = vmatpush3.bf16.msra.mxu0 %v2728_v39  ;;  %2095 = vmatpush3.bf16.msra.mxu1 %v2718_v33 }
 0x4d0   :  { %2078 = vmatprep.subr.bf16.mxu0 %v2626_v16  ;;  %2096 = vmatprep.subr.bf16.mxu1 %v2626_v16 }
 0x4d3   :  { %2079 = vmatpush3.bf16.msra.mxu0 %v2737_v42  ;;  %2097 = vmatpush3.bf16.msra.mxu1 %v2726_v38 }
 0x4d4   :  { %2080 = vmatprep.subr.bf16.mxu0 %v2626_v16  ;;  %2098 = vmatprep.subr.bf16.mxu1 %v2626_v16 }
 0x4d7   :  { %2081 = vmatpush3.bf16.msra.mxu0 %v2746_v44  ;;  %2099 = vmatpush3.bf16.msra.mxu1 %v2735_v41 }
 0x4d8   :  { %2106 = vmatprep.subr.bf16.mxu0 %v2626_v16  ;;  %2100 = vmatprep.subr.bf16.mxu1 %v2626_v16 }
 0x4da   :  { %2083 = vmatmul.mubr.bf16.vlgmr.msra.gmra.mxu0 %v719_v52 }
 0x4db   :  { %2107 = vmatpush3.bf16.msra.mxu0 %v2786_v54  ;;  %2101 = vmatpush3.bf16.msra.mxu1 %v2744_v43 }
 0x4dc   :  { %2108 = vmatprep.subr.bf16.mxu0 %v2626_v16  ;;  %2126 = vmatprep.subr.bf16.mxu1 %v2626_v16 }
 0x4dd   :  { %2122 = vmatprep.mubr.msk.bf16.mxu0 %vm2628_vm0, %v2626_v16 }
 0x4df   :  { %2109 = vmatpush3.bf16.msra.mxu0 %v2789_v55 }
 0x4e0   :  { %2110 = vmatprep.subr.bf16.mxu0 %v2626_v16 }
 0x4e3   :  { %2111 = vmatpush3.bf16.msra.mxu0 %v2811_v23 }
 0x4e4   :  { %2112 = vmatprep.subr.bf16.mxu0 %v2626_v16 }
 0x4e7   :  { %2113 = vmatpush3.bf16.msra.mxu0 %v2815_v24 }
 0x4e8   :  { %2114 = vmatprep.subr.bf16.mxu0 %v2626_v16 }
 0x4eb   :  { %2115 = vmatpush3.bf16.msra.mxu0 %v2819_v25 }
 0x4ec   :  { %2116 = vmatprep.subr.bf16.mxu0 %v2626_v16 }
 0x4ef   :  { %2117 = vmatpush3.bf16.msra.mxu0 %v2823_v31 }
 0x4f0   :  { %2118 = vmatprep.subr.bf16.mxu0 %v2626_v16 }
 0x4f3   :  { %2119 = vmatpush3.bf16.msra.mxu0 %v2829_v35 }
 0x4f4   :  { %2120 = vmatprep.subr.bf16.mxu0 %v2626_v16 }
 0x4f7   :  { %2121 = vmatpush3.bf16.msra.mxu0 %v2834_v36 }
 0x4f8   :  { %2146 = vmatprep.subr.bf16.mxu0 %v2626_v16 }
 0x57a   :  { %v754_v6 = vpop.f32.mrf.mxu0 }
 0x57b   :  { %v755_v4 = vadd.f32 %v2807_v62, %v754_v6 }
 0x57c   :  { %v2044_v22 = vpop.f32.mrf.mxu0 }
 0x57e   :  { %v757_v50 = vpop.f32.mrf.mxu0  ;;  %v794_v51 = vpop.f32.mrf.mxu1 }
 0x57f   :  { %v800_v19 = vadd.f32 %v794_v51, %v755_v4  ;;  %v811_v32 = vadd.f32 %v2842_v37, %v794_v51 }
 0x580   :  { %v2045_v53 = vpop.f32.mrf.mxu0  ;;  %v2064_v57 = vpop.f32.mrf.mxu1 }
 0x581   :  { %v1681_v7 = vmul.f32 -1.442695, %v800_v19 }
 0x582   :  { %v797_v0 = vpop.f32.mrf.mxu1 }
 0x583   :  { %2439 = vpow2.f32 %v1681_v7 }
 0x584   :  { %v2065_v3 = vpop.f32.mrf.mxu1 }
 0x590   :  { %v2440_v12 = vpop.eup %2439 }
 0x591   :  { %v804_v30 = vadd.f32 1.0, %v2440_v12 }
 0x59a   :  { %v855_v1 = vpop.f32.mrf.mxu0 }
 0x59b   :  { %v861_v63 = vadd.f32 %v855_v1, %v265_v5  ;;  %v872_v46 = vadd.f32 %v2759_v45, %v855_v1 }
 0x59c   :  { %v2084_v2 = vpop.f32.mrf.mxu0 }
 0x59d   :  { %v1682_v9 = vmul.f32 -1.442695, %v861_v63 }
 0x59e   :  { %v858_v10 = vpop.f32.mrf.mxu0 }
 0x59f   :  { %2441 = vpow2.f32 %v1682_v9 }
 0x5a0   :  { %v2085_v11 = vpop.f32.mrf.mxu0 }
 0x5ac   :  { %v2442_v13 = vpop.eup %2441 }
 0x5ad   :  { %v865_v21 = vadd.f32 1.0, %v2442_v13 }
 0x5af   :  { %2443 = vrcp.f32 %v865_v21 }
 0x5b0   :  { %2445 = vrcp.f32 %v804_v30  ;;  %v270_v30 = vadd.f32 %v2699_v20, %v2798_v59 }
 0x5bc   :  { %v2444_v40 = vpop.eup %2443 }
 0x5bd   :  { %870 = vrot.lane.b32.xlu1 %v2444_v40, %s2627_s11  ;;  %868 = vrot.lane.b32.xlu0 %v2444_v40, %s2620_s21  ;;  %v2446_v56 = vpop.eup %2445 }
 0x5c1   :  { %809 = vrot.lane.b32.xlu1 %v2446_v56, %s2627_s11  ;;  %807 = vrot.lane.b32.xlu0 %v2446_v56, %s2620_s21 }
 0x62f   :  { %v869_v48 = vpop.permute.xlu0 %868  ;;  %v871_v57 = vpop.permute.xlu1 %870 }
 0x630   :  { %v873_v52 = vmul.f32 %v872_v46, %v869_v48 }
 0x632   :  { %v874_v8 = vadd.f32 %v873_v52, %v265_v5 }
 0x633   :  { %v808_v6 = vpop.permute.xlu0 %807  ;;  %v810_v63 = vpop.permute.xlu1 %809 }
 0x634   :  { %2447 = vtanh.f32 %v874_v8  ;;  %v812_v22 = vmul.f32 %v811_v32, %v808_v6 }
 0x636   :  { %v813_v50 = vadd.f32 %v812_v22, %v755_v4 }
 0x638   :  { %2449 = vtanh.f32 %v813_v50 }
 0x641   :  { %v2448_v53 = vpop.eup %2447 }
 0x642   :  { %v876_v0 = vsub.f32 %v2920_v47, %v2448_v53 }
 0x644   :  { %v877_v3 = vmul.f32 %v876_v0, %v871_v57 }
 0x645   :  { %v2450_v19 = vpop.eup %2449 }
 0x646   :  { %v2994_v7 = vadd.f32 %v2448_v53, %v877_v3  ;;  %v815_v1 = vsub.f32 %v2925_v49, %v2450_v19 }
 0x648   :  { %v879_v51 = vpack.c.bf16 %v2994_v7, %v2994_v7  ;;  %v816_v5 = vmul.f32 %v815_v1, %v810_v63 }
 0x64a   :  { %2103 = vmatmul.mubr.bf16.vlgmr.msra.gmra.mxu1 %v879_v51  ;;  %v2999_v2 = vadd.f32 %v2450_v19, %v816_v5 }
 0x64b   :  { %2127 = vmatpush3.bf16.msra.mxu1 %v2678_v15  ;;  %2142 = vmatprep.mubr.msk.bf16.mxu1 %vm2628_vm0, %v2626_v16 }
 0x64c   :  { %2128 = vmatprep.subr.bf16.mxu1 %v2626_v16  ;;  %v818_v47 = vpack.c.bf16 %v2999_v2, %v2999_v2  ;;  %820 = vst [vmem:[#allocation8 + $0x10] sm:$0xff] %v2999_v2 }
 0x64e   :  { %2123 = vmatmul.mubr.bf16.vlgmr.msra.gmra.mxu0 %v818_v47 }
 0x64f   :  { %2129 = vmatpush3.bf16.msra.mxu1 %v2686_v18  ;;  %2147 = vmatpush3.bf16.msra.mxu0 %v2676_v14 }
 0x650   :  { %2130 = vmatprep.subr.bf16.mxu1 %v2626_v16  ;;  %2148 = vmatprep.subr.bf16.mxu0 %v2626_v16 }
 0x651   :  { %2162 = vmatprep.mubr.msk.bf16.mxu0 %vm2628_vm0, %v2626_v16 }
 0x653   :  { %2131 = vmatpush3.bf16.msra.mxu1 %v2704_v27  ;;  %2149 = vmatpush3.bf16.msra.mxu0 %v2684_v17 }
 0x654   :  { %2132 = vmatprep.subr.bf16.mxu1 %v2626_v16  ;;  %2150 = vmatprep.subr.bf16.mxu0 %v2626_v16 }
 0x657   :  { %2133 = vmatpush3.bf16.msra.mxu1 %v2712_v29  ;;  %2151 = vmatpush3.bf16.msra.mxu0 %v2702_v26 }
 0x658   :  { %2134 = vmatprep.subr.bf16.mxu1 %v2626_v16  ;;  %2152 = vmatprep.subr.bf16.mxu0 %v2626_v16 }
 0x65b   :  { %2135 = vmatpush3.bf16.msra.mxu1 %v2720_v34  ;;  %2153 = vmatpush3.bf16.msra.mxu0 %v2710_v28 }
 0x65c   :  { %2136 = vmatprep.subr.bf16.mxu1 %v2626_v16  ;;  %2154 = vmatprep.subr.bf16.mxu0 %v2626_v16 }
 0x65f   :  { %2137 = vmatpush3.bf16.msra.mxu1 %v2728_v39  ;;  %2155 = vmatpush3.bf16.msra.mxu0 %v2718_v33 }
 0x660   :  { %2138 = vmatprep.subr.bf16.mxu1 %v2626_v16  ;;  %2156 = vmatprep.subr.bf16.mxu0 %v2626_v16 }
 0x663   :  { %2139 = vmatpush3.bf16.msra.mxu1 %v2737_v42  ;;  %2157 = vmatpush3.bf16.msra.mxu0 %v2726_v38 }
 0x664   :  { %2140 = vmatprep.subr.bf16.mxu1 %v2626_v16  ;;  %2158 = vmatprep.subr.bf16.mxu0 %v2626_v16 }
 0x667   :  { %2141 = vmatpush3.bf16.msra.mxu1 %v2746_v44  ;;  %2159 = vmatpush3.bf16.msra.mxu0 %v2735_v41 }
 0x668   :  { %2166 = vmatprep.subr.bf16.mxu1 %v2626_v16  ;;  %2160 = vmatprep.subr.bf16.mxu0 %v2626_v16 }
 0x66a   :  { %2143 = vmatmul.mubr.bf16.vlgmr.msra.gmra.mxu1 %v879_v51 }
 0x66b   :  { %2167 = vmatpush3.bf16.msra.mxu1 %v2786_v54  ;;  %2161 = vmatpush3.bf16.msra.mxu0 %v2744_v43 }
 0x66c   :  { %2168 = vmatprep.subr.bf16.mxu1 %v2626_v16  ;;  %2186 = vmatprep.subr.bf16.mxu0 %v2626_v16 }
 0x66d   :  { %2182 = vmatprep.mubr.msk.bf16.mxu1 %vm2628_vm0, %v2626_v16 }
 0x66f   :  { %2169 = vmatpush3.bf16.msra.mxu1 %v2789_v55 }
 0x670   :  { %2170 = vmatprep.subr.bf16.mxu1 %v2626_v16 }
 0x673   :  { %2171 = vmatpush3.bf16.msra.mxu1 %v2811_v23 }
 0x674   :  { %2172 = vmatprep.subr.bf16.mxu1 %v2626_v16 }
 0x677   :  { %2173 = vmatpush3.bf16.msra.mxu1 %v2815_v24 }
 0x678   :  { %2174 = vmatprep.subr.bf16.mxu1 %v2626_v16 }
 0x67b   :  { %2175 = vmatpush3.bf16.msra.mxu1 %v2819_v25 }
 0x67c   :  { %2176 = vmatprep.subr.bf16.mxu1 %v2626_v16 }
 0x67f   :  { %2177 = vmatpush3.bf16.msra.mxu1 %v2823_v31 }
 0x680   :  { %2178 = vmatprep.subr.bf16.mxu1 %v2626_v16 }
 0x683   :  { %2179 = vmatpush3.bf16.msra.mxu1 %v2829_v35 }
 0x684   :  { %2180 = vmatprep.subr.bf16.mxu1 %v2626_v16 }
 0x687   :  { %2181 = vmatpush3.bf16.msra.mxu1 %v2834_v36 }
 0x688   :  { %2206 = vmatprep.subr.bf16.mxu1 %v2626_v16 }
 0x70a   :  { %v914_v14 = vpop.f32.mrf.mxu1 }
 0x70b   :  { %v915_v13 = vadd.f32 %v2807_v62, %v914_v14 }
 0x70c   :  { %v2104_v17 = vpop.f32.mrf.mxu1 }
 0x70e   :  { %v917_v49 = vpop.f32.mrf.mxu1  ;;  %v954_v4 = vpop.f32.mrf.mxu0 }
 0x70f   :  { %v960_v21 = vadd.f32 %v954_v4, %v915_v13  ;;  %v971_v19 = vadd.f32 %v2842_v37, %v954_v4 }
 0x710   :  { %v2105_v9 = vpop.f32.mrf.mxu1  ;;  %v2124_v10 = vpop.f32.mrf.mxu0 }
 0x711   :  { %v1683_v40 = vmul.f32 -1.442695, %v960_v21 }
 0x712   :  { %v957_v11 = vpop.f32.mrf.mxu0 }
 0x713   :  { %2451 = vpow2.f32 %v1683_v40  ;;  %v3151_v40 = vld [vmem:[%s3371_s4] ss:$0 sm:$0xff] }
 0x714   :  { %v2125_v12 = vpop.f32.mrf.mxu0 }
 0x720   :  { %v2452_v6 = vpop.eup %2451 }
 0x721   :  { %v964_v53 = vadd.f32 1.0, %v2452_v6 }
 0x72a   :  { %v1015_v56 = vpop.f32.mrf.mxu1 }
 0x72b   :  { %v1021_v46 = vadd.f32 %v1015_v56, %v270_v30  ;;  %v1032_v59 = vadd.f32 %v2759_v45, %v1015_v56 }
 0x72c   :  { %v2144_v48 = vpop.f32.mrf.mxu1 }
 0x72d   :  { %v1684_v52 = vmul.f32 -1.442695, %v1021_v46 }
 0x72e   :  { %v1018_v32 = vpop.f32.mrf.mxu1 }
 0x72f   :  { %2453 = vpow2.f32 %v1684_v52 }
 0x730   :  { %v2145_v8 = vpop.f32.mrf.mxu1 }
 0x73c   :  { %v2454_v22 = vpop.eup %2453 }
 0x73d   :  { %v1025_v50 = vadd.f32 1.0, %v2454_v22 }
 0x73f   :  { %2455 = vrcp.f32 %v1025_v50 }
 0x740   :  { %2457 = vrcp.f32 %v964_v53 }
 0x74c   :  { %v2456_v57 = vpop.eup %2455 }
 0x74d   :  { %1030 = vrot.lane.b32.xlu1 %v2456_v57, %s2627_s11  ;;  %1028 = vrot.lane.b32.xlu0 %v2456_v57, %s2620_s21  ;;  %v2458_v20 = vpop.eup %2457 }
 0x751   :  { %969 = vrot.lane.b32.xlu1 %v2458_v20, %s2627_s11  ;;  %967 = vrot.lane.b32.xlu0 %v2458_v20, %s2620_s21 }
 0x7bf   :  { %v1029_v0 = vpop.permute.xlu0 %1028  ;;  %v1031_v14 = vpop.permute.xlu1 %1030 }
 0x7c0   :  { %v1033_v3 = vmul.f32 %v1032_v59, %v1029_v0 }
 0x7c2   :  { %v1034_v1 = vadd.f32 %v1033_v3, %v270_v30 }
 0x7c3   :  { %v968_v63 = vpop.permute.xlu0 %967  ;;  %v970_v11 = vpop.permute.xlu1 %969 }
 0x7c4   :  { %2459 = vtanh.f32 %v1034_v1  ;;  %v972_v51 = vmul.f32 %v971_v19, %v968_v63 }
 0x7c6   :  { %v973_v5 = vadd.f32 %v972_v51, %v915_v13  ;;  %v3163_v51 = vld [vmem:[#allocation7 + $0x38] sm:$0xff]  }
 0x7c8   :  { %2461 = vtanh.f32 %v973_v5 }
 0x7d1   :  { %v2460_v47 = vpop.eup %2459 }
 0x7d2   :  { %v1036_v17 = vsub.f32 %v2994_v7, %v2460_v47 }
 0x7d4   :  { %v1037_v49 = vmul.f32 %v1036_v17, %v1031_v14  ;;  %v3180_v14 = vld [vmem:[#allocation7 + $0x28] sm:$0xff]   ;;  %v3186_v17 = vld [vmem:[#allocation7 + $0x20] sm:$0xff]  }
 0x7d5   :  { %v2462_v9 = vpop.eup %2461 }
 0x7d6   :  { %v3068_v10 = vadd.f32 %v2460_v47, %v1037_v49  ;;  %v975_v45 = vsub.f32 %v2999_v2, %v2462_v9  ;;  %v3083_v2 = vld [vmem:[#allocation5 + $0x78] sm:$0xff]   ;;  %v3172_v47 = vld [vmem:[#allocation7 + $0x30] sm:$0xff]   ;;  %v3189_v49 = vld [vmem:[#allocation5 + $0x68] sm:$0xff]  }
 0x7d8   :  { %v1039_v4 = vpack.c.bf16 %v3068_v10, %v3068_v10  ;;  %v976_v12 = vmul.f32 %v975_v45, %v970_v11  ;;  %v3202_v45 = vld [vmem:[#allocation7 + $0x10] sm:$0xff]   ;;  %v3205_v11 = vld [vmem:[#allocation5 + $0x58] sm:$0xff]  }
 0x7da   :  { %2163 = vmatmul.mubr.bf16.vlgmr.msra.gmra.mxu0 %v1039_v4  ;;  %v3073_v21 = vadd.f32 %v2462_v9, %v976_v12  ;;  %v3194_v9 = vld [vmem:[#allocation7 + $0x18] sm:$0xff]   ;;  %v3213_v12 = vld [vmem:[#allocation5 + $0x50] sm:$0xff]  }
 0x7db   :  { %2187 = vmatpush3.bf16.msra.mxu0 %v2678_v15  ;;  %2202 = vmatprep.mubr.msk.bf16.mxu0 %vm2628_vm0, %v2626_v16  ;;  %v3091_v15 = vld [vmem:[#allocation5 + $0x70] sm:$0xff]  }
 0x7dc   :  { %2188 = vmatprep.subr.bf16.mxu0 %v2626_v16  ;;  %v978_v7 = vpack.c.bf16 %v3073_v21, %v3073_v21  ;;  %980 = vst [vmem:[#allocation8 + $0x18] sm:$0xff] %v3073_v21 }
 0x7de   :  { %2183 = vmatmul.mubr.bf16.vlgmr.msra.gmra.mxu1 %v978_v7  ;;  %v3221_v7 = vld [vmem:[#allocation5 + $0x48] sm:$0xff]  }
 0x7df   :  { %2189 = vmatpush3.bf16.msra.mxu0 %v2686_v18  ;;  %2207 = vmatpush3.bf16.msra.mxu1 %v3083_v2 }
 0x7e0   :  { %2190 = vmatprep.subr.bf16.mxu0 %v2626_v16  ;;  %2208 = vmatprep.subr.bf16.mxu1 %v2626_v16 }
 0x7e1   :  { %2222 = vmatprep.mubr.msk.bf16.mxu1 %vm2628_vm0, %v2626_v16 }
 0x7e3   :  { %2191 = vmatpush3.bf16.msra.mxu0 %v2704_v27  ;;  %2209 = vmatpush3.bf16.msra.mxu1 %v3091_v15 }
 0x7e4   :  { %2192 = vmatprep.subr.bf16.mxu0 %v2626_v16  ;;  %2210 = vmatprep.subr.bf16.mxu1 %v2626_v16 }
 0x7e7   :  { %2193 = vmatpush3.bf16.msra.mxu0 %v2712_v29  ;;  %2211 = vmatpush3.bf16.msra.mxu1 %v2702_v26 }
 0x7e8   :  { %2194 = vmatprep.subr.bf16.mxu0 %v2626_v16  ;;  %2212 = vmatprep.subr.bf16.mxu1 %v2626_v16 }
 0x7eb   :  { %2195 = vmatpush3.bf16.msra.mxu0 %v2720_v34  ;;  %2213 = vmatpush3.bf16.msra.mxu1 %v2710_v28 }
 0x7ec   :  { %2196 = vmatprep.subr.bf16.mxu0 %v2626_v16  ;;  %2214 = vmatprep.subr.bf16.mxu1 %v2626_v16 }
 0x7ef   :  { %2197 = vmatpush3.bf16.msra.mxu0 %v2728_v39  ;;  %2215 = vmatpush3.bf16.msra.mxu1 %v2718_v33 }
 0x7f0   :  { %2198 = vmatprep.subr.bf16.mxu0 %v2626_v16  ;;  %2216 = vmatprep.subr.bf16.mxu1 %v2626_v16 }
 0x7f3   :  { %2199 = vmatpush3.bf16.msra.mxu0 %v2737_v42  ;;  %2217 = vmatpush3.bf16.msra.mxu1 %v2726_v38  ;;  %v3140_v42 = vld [vmem:[%s3370_s3] ss:$0 sm:$0xff] }
 0x7f4   :  { %2200 = vmatprep.subr.bf16.mxu0 %v2626_v16  ;;  %2218 = vmatprep.subr.bf16.mxu1 %v2626_v16 }
 0x7f7   :  { %2201 = vmatpush3.bf16.msra.mxu0 %v2746_v44  ;;  %2219 = vmatpush3.bf16.msra.mxu1 %v2735_v41 }
 0x7f8   :  { %2226 = vmatprep.subr.bf16.mxu0 %v2626_v16  ;;  %2220 = vmatprep.subr.bf16.mxu1 %v2626_v16 }
 0x7fa   :  { %2203 = vmatmul.mubr.bf16.vlgmr.msra.gmra.mxu0 %v1039_v4  ;;  %v3210_v4 = vld [vmem:[#allocation7 + $0x8] sm:$0xff]  }
 0x7fb   :  { %2227 = vmatpush3.bf16.msra.mxu0 %v2786_v54  ;;  %2221 = vmatpush3.bf16.msra.mxu1 %v2744_v43  ;;  %v273_v43 = vadd.f32 %v3140_v42, %v2802_v61 }
 0x7fc   :  { %2228 = vmatprep.subr.bf16.mxu0 %v2626_v16  ;;  %2246 = vmatprep.subr.bf16.mxu1 %v2626_v16 }
 0x7fd   :  { %2242 = vmatprep.mubr.msk.bf16.mxu0 %vm2628_vm0, %v2626_v16 }
 0x7ff   :  { %2229 = vmatpush3.bf16.msra.mxu0 %v2789_v55 }
 0x800   :  { %2230 = vmatprep.subr.bf16.mxu0 %v2626_v16 }
 0x803   :  { %2231 = vmatpush3.bf16.msra.mxu0 %v2811_v23 }
 0x804   :  { %2232 = vmatprep.subr.bf16.mxu0 %v2626_v16 }
 0x807   :  { %2233 = vmatpush3.bf16.msra.mxu0 %v2815_v24 }
 0x808   :  { %2234 = vmatprep.subr.bf16.mxu0 %v2626_v16 }
 0x80b   :  { %2235 = vmatpush3.bf16.msra.mxu0 %v2819_v25 }
 0x80c   :  { %2236 = vmatprep.subr.bf16.mxu0 %v2626_v16 }
 0x80f   :  { %2237 = vmatpush3.bf16.msra.mxu0 %v2823_v31 }
 0x810   :  { %2238 = vmatprep.subr.bf16.mxu0 %v2626_v16 }
 0x813   :  { %2239 = vmatpush3.bf16.msra.mxu0 %v2829_v35 }
 0x814   :  { %2240 = vmatprep.subr.bf16.mxu0 %v2626_v16 }
 0x817   :  { %2241 = vmatpush3.bf16.msra.mxu0 %v2834_v36 }
 0x818   :  { %2266 = vmatprep.subr.bf16.mxu0 %v2626_v16 }
 0x89a   :  { %v1074_v18 = vpop.f32.mrf.mxu0 }
 0x89b   :  { %v1075_v39 = vadd.f32 %v2807_v62, %v1074_v18  ;;  %v3226_v18 = vld [vmem:[#allocation7 + $0x78] sm:$0xff]  }
 0x89c   :  { %v2164_v26 = vpop.f32.mrf.mxu0 }
 0x89d   :  { %v3229_v26 = vld [vmem:[#allocation5 + $0x40] sm:$0xff]  }
 0x89e   :  { %v1077_v27 = vpop.f32.mrf.mxu0  ;;  %v1114_v28 = vpop.f32.mrf.mxu1 }
 0x89f   :  { %v1120_v41 = vadd.f32 %v1114_v28, %v1075_v39  ;;  %v1131_v52 = vadd.f32 %v2842_v37, %v1114_v28  ;;  %v3236_v27 = vld [vmem:[#allocation7 + $0x70] sm:$0xff]   ;;  %v3240_v28 = vld [vmem:[#allocation7 + $0x68] sm:$0xff]  }
 0x8a0   :  { %v2165_v29 = vpop.f32.mrf.mxu0  ;;  %v2184_v33 = vpop.f32.mrf.mxu1 }
 0x8a1   :  { %v1685_v44 = vmul.f32 -1.442695, %v1120_v41  ;;  %v3244_v29 = vld [vmem:[#allocation7 + $0x60] sm:$0xff]   ;;  %v3248_v33 = vld [vmem:[#allocation7 + $0x58] sm:$0xff]  }
 0x8a2   :  { %v1117_v34 = vpop.f32.mrf.mxu1 }
 0x8a3   :  { %2463 = vpow2.f32 %v1685_v44  ;;  %v3252_v34 = vld [vmem:[#allocation7 + $0x50] sm:$0xff]  }
 0x8a4   :  { %v2185_v38 = vpop.f32.mrf.mxu1 }
 0x8a5   :  { %v3256_v38 = vld [vmem:[#allocation7 + $0x48] sm:$0xff]  }
 0x8b0   :  { %v2464_v35 = vpop.eup %2463 }
 0x8b1   :  { %v1124_v13 = vadd.f32 1.0, %v2464_v35 }
 0x8ba   :  { %v1175_v54 = vpop.f32.mrf.mxu0 }
 0x8bb   :  { %v1181_v55 = vadd.f32 %v1175_v54, %v273_v43  ;;  %v1192_v56 = vadd.f32 %v3151_v40, %v1175_v54 }
 0x8bc   :  { %v2204_v23 = vpop.f32.mrf.mxu0 }
 0x8bd   :  { %v1686_v24 = vmul.f32 -1.442695, %v1181_v55 }
 0x8be   :  { %v1178_v25 = vpop.f32.mrf.mxu0 }
 0x8bf   :  { %2465 = vpow2.f32 %v1686_v24 }
 0x8c0   :  { %v2205_v31 = vpop.f32.mrf.mxu0 }
 0x8c1   :  { %v3267_v31 = vld [vmem:[%s3370_s3 + $0x1] ss:$0 sm:$0xff] }
 0x8cc   :  { %v2466_v62 = vpop.eup %2465 }
 0x8cd   :  { %v1185_v36 = vadd.f32 1.0, %v2466_v62 }
 0x8cf   :  { %2467 = vrcp.f32 %v1185_v36  ;;  %v278_v36 = vadd.f32 %v3140_v42, %v2796_v58 }
 0x8d0   :  { %2469 = vrcp.f32 %v1124_v13 }
 0x8dc   :  { %v2468_v30 = vpop.eup %2467 }
 0x8dd   :  { %1190 = vrot.lane.b32.xlu1 %v2468_v30, %s2627_s11  ;;  %1188 = vrot.lane.b32.xlu0 %v2468_v30, %s2620_s21  ;;  %v2470_v61 = vpop.eup %2469 }
 0x8e1   :  { %1129 = vrot.lane.b32.xlu1 %v2470_v61, %s2627_s11  ;;  %1127 = vrot.lane.b32.xlu0 %v2470_v61, %s2620_s21 }
 0x94f   :  { %v1189_v46 = vpop.permute.xlu0 %1188  ;;  %v1191_v53 = vpop.permute.xlu1 %1190 }
 0x950   :  { %v1193_v48 = vmul.f32 %v1192_v56, %v1189_v46 }
 0x952   :  { %v1194_v32 = vadd.f32 %v1193_v48, %v273_v43 }
 0x953   :  { %v1128_v8 = vpop.permute.xlu0 %1127  ;;  %v1130_v19 = vpop.permute.xlu1 %1129 }
 0x954   :  { %2471 = vtanh.f32 %v1194_v32  ;;  %v1132_v6 = vmul.f32 %v1131_v52, %v1128_v8 }
 0x956   :  { %v1133_v22 = vadd.f32 %v1132_v6, %v1075_v39  ;;  %v3260_v39 = vld [vmem:[#allocation7 + $0x40] sm:$0xff]  }
 0x958   :  { %2473 = vtanh.f32 %v1133_v22 }
 0x961   :  { %v2472_v50 = vpop.eup %2471 }
 0x962   :  { %v1196_v57 = vsub.f32 %v3068_v10, %v2472_v50  ;;  %v3197_v10 = vld [vmem:[#allocation5 + $0x60] sm:$0xff]  }
 0x964   :  { %v1197_v20 = vmul.f32 %v1196_v57, %v1191_v53 }
 0x965   :  { %v2474_v59 = vpop.eup %2473 }
 0x966   :  { %v3156_v0 = vadd.f32 %v2472_v50, %v1197_v20  ;;  %v1135_v3 = vsub.f32 %v3073_v21, %v2474_v59  ;;  %v3218_v21 = vld [vmem:[#allocation7] sm:$0xff]  }
 0x968   :  { %v1199_v37 = vpack.c.bf16 %v3156_v0, %v3156_v0  ;;  %v1136_v1 = vmul.f32 %v1135_v3, %v1130_v19 }
 0x96a   :  { %2223 = vmatmul.mubr.bf16.vlgmr.msra.gmra.mxu1 %v1199_v37  ;;  %v3161_v63 = vadd.f32 %v2474_v59, %v1136_v1  ;;  %v3280_v59 = vld [vmem:[%s3371_s4 + $0x1] ss:$0 sm:$0xff]  ;;  %s2629_s4 = smov [#allocation8]  }
 0x96b   :  { %2247 = vmatpush3.bf16.msra.mxu1 %v3163_v51  ;;  %2262 = vmatprep.mubr.msk.bf16.mxu1 %vm2628_vm0, %v2626_v16  ;;  %s1625_s26 = sshll.u32 %s2629_s4, 4  ;;  %s1626_s26 = int_to_ptr.vmem [resolvable:$true] %s1625_s26 }
 0x96c   :  { %2248 = vmatprep.subr.bf16.mxu1 %v2626_v16  ;;  %v1138_v5 = vpack.c.bf16 %v3161_v63, %v3161_v63  ;;  %1140 = vst [vmem:[#allocation8 + $0x20] sm:$0xff] %v3161_v63  ;;  %s2593_s27 = scalar_lea.vmem %s1626_s26, 1024  ;;  %p2598_p2 = scmp.lt.s32.totalorder %s1626_s26, %s1626_s26 }
 0x96d   :  { %p2594_p1 = scmp.ne.s32.totalorder %s1626_s26, %s2593_s27  ;;  %p2599_p3 = scmp.lt.s32.totalorder %s2593_s27, %s2593_s27 }
 0x96e   :  { %2243 = vmatmul.mubr.bf16.vlgmr.msra.gmra.mxu0 %v1138_v5 }
 0x96f   :  { %2249 = vmatpush3.bf16.msra.mxu1 %v3172_v47  ;;  %2267 = vmatpush3.bf16.msra.mxu0 %v3083_v2  ;;  %p2600_p4 = por %p2599_p3, %p2598_p2 }
 0x970   :  { %2250 = vmatprep.subr.bf16.mxu1 %v2626_v16  ;;  %2268 = vmatprep.subr.bf16.mxu0 %v2626_v16 }
 0x971   :  { %2282 = vmatprep.mubr.msk.bf16.mxu0 %vm2628_vm0, %v2626_v16  ;;  %p2601_p5 = pnand %p2600_p4, %p2594_p1 }
 0x973   :  { %2251 = vmatpush3.bf16.msra.mxu1 %v3180_v14  ;;  %2269 = vmatpush3.bf16.msra.mxu0 %v3091_v15 }
 0x974   :  { %2252 = vmatprep.subr.bf16.mxu1 %v2626_v16  ;;  %2270 = vmatprep.subr.bf16.mxu0 %v2626_v16 }
 0x977   :  { %2253 = vmatpush3.bf16.msra.mxu1 %v3186_v17  ;;  %2271 = vmatpush3.bf16.msra.mxu0 %v3189_v49 }
 0x978   :  { %2254 = vmatprep.subr.bf16.mxu1 %v2626_v16  ;;  %2272 = vmatprep.subr.bf16.mxu0 %v2626_v16 }
 0x97b   :  { %2255 = vmatpush3.bf16.msra.mxu1 %v3194_v9  ;;  %2273 = vmatpush3.bf16.msra.mxu0 %v3197_v10 }
 0x97c   :  { %2256 = vmatprep.subr.bf16.mxu1 %v2626_v16  ;;  %2274 = vmatprep.subr.bf16.mxu0 %v2626_v16 }
 0x97f   :  { %2257 = vmatpush3.bf16.msra.mxu1 %v3202_v45  ;;  %2275 = vmatpush3.bf16.msra.mxu0 %v3205_v11 }
 0x980   :  { %2258 = vmatprep.subr.bf16.mxu1 %v2626_v16  ;;  %2276 = vmatprep.subr.bf16.mxu0 %v2626_v16 }
 0x983   :  { %2259 = vmatpush3.bf16.msra.mxu1 %v3210_v4  ;;  %2277 = vmatpush3.bf16.msra.mxu0 %v3213_v12 }
 0x984   :  { %2260 = vmatprep.subr.bf16.mxu1 %v2626_v16  ;;  %2278 = vmatprep.subr.bf16.mxu0 %v2626_v16 }
 0x987   :  { %2261 = vmatpush3.bf16.msra.mxu1 %v3218_v21  ;;  %2279 = vmatpush3.bf16.msra.mxu0 %v3221_v7 }
 0x988   :  { %2286 = vmatprep.subr.bf16.mxu1 %v2626_v16  ;;  %2280 = vmatprep.subr.bf16.mxu0 %v2626_v16 }
 0x98a   :  { %2263 = vmatmul.mubr.bf16.vlgmr.msra.gmra.mxu1 %v1199_v37 }
 0x98b   :  { %2287 = vmatpush3.bf16.msra.mxu1 %v3226_v18  ;;  %2281 = vmatpush3.bf16.msra.mxu0 %v3229_v26 }
 0x98c   :  { %2288 = vmatprep.subr.bf16.mxu1 %v2626_v16  ;;  %2306 = vmatprep.subr.bf16.mxu0 %v2626_v16 }
 0x98d   :  { %2302 = vmatprep.mubr.msk.bf16.mxu1 %vm2628_vm0, %v2626_v16 }
 0x98f   :  { %2289 = vmatpush3.bf16.msra.mxu1 %v3236_v27 }
 0x990   :  { %2290 = vmatprep.subr.bf16.mxu1 %v2626_v16 }
 0x993   :  { %2291 = vmatpush3.bf16.msra.mxu1 %v3240_v28 }
 0x994   :  { %2292 = vmatprep.subr.bf16.mxu1 %v2626_v16 }
 0x997   :  { %2293 = vmatpush3.bf16.msra.mxu1 %v3244_v29 }
 0x998   :  { %2294 = vmatprep.subr.bf16.mxu1 %v2626_v16 }
 0x99b   :  { %2295 = vmatpush3.bf16.msra.mxu1 %v3248_v33 }
 0x99c   :  { %2296 = vmatprep.subr.bf16.mxu1 %v2626_v16 }
 0x99f   :  { %2297 = vmatpush3.bf16.msra.mxu1 %v3252_v34 }
 0x9a0   :  { %2298 = vmatprep.subr.bf16.mxu1 %v2626_v16 }
 0x9a3   :  { %2299 = vmatpush3.bf16.msra.mxu1 %v3256_v38 }
 0x9a4   :  { %2300 = vmatprep.subr.bf16.mxu1 %v2626_v16 }
 0x9a7   :  { %2301 = vmatpush3.bf16.msra.mxu1 %v3260_v39 }
 0x9a8   :  { %2326 = vmatprep.subr.bf16.mxu1 %v2626_v16 }
 0xa2a   :  { %v1234_v41 = vpop.f32.mrf.mxu1 }
 0xa2b   :  { %v1235_v35 = vadd.f32 %v3267_v31, %v1234_v41 }
 0xa2c   :  { %v2224_v43 = vpop.f32.mrf.mxu1 }
 0xa2e   :  { %v1237_v44 = vpop.f32.mrf.mxu1  ;;  %v1274_v54 = vpop.f32.mrf.mxu0 }
 0xa2f   :  { %v1280_v62 = vadd.f32 %v1274_v54, %v1235_v35  ;;  %v1291_v3 = vadd.f32 %v3280_v59, %v1274_v54 }
 0xa30   :  { %v2225_v55 = vpop.f32.mrf.mxu1  ;;  %v2244_v23 = vpop.f32.mrf.mxu0 }
 0xa31   :  { %v1687_v13 = vmul.f32 -1.442695, %v1280_v62 }
 0xa32   :  { %v1277_v24 = vpop.f32.mrf.mxu0 }
 0xa33   :  { %2475 = vpow2.f32 %v1687_v13 }
 0xa34   :  { %v2245_v25 = vpop.f32.mrf.mxu0 }
 0xa40   :  { %v2476_v32 = vpop.eup %2475 }
 0xa41   :  { %v1284_v22 = vadd.f32 1.0, %v2476_v32 }
 0xa4a   :  { %v1335_v30 = vpop.f32.mrf.mxu1 }
 0xa4b   :  { %v1341_v61 = vadd.f32 %v1335_v30, %v278_v36  ;;  %v1352_v53 = vadd.f32 %v3151_v40, %v1335_v30 }
 0xa4c   :  { %v2264_v56 = vpop.f32.mrf.mxu1 }
 0xa4d   :  { %v1688_v46 = vmul.f32 -1.442695, %v1341_v61 }
 0xa4e   :  { %v1338_v48 = vpop.f32.mrf.mxu1 }
 0xa4f   :  { %2477 = vpow2.f32 %v1688_v46 }
 0xa50   :  { %v2265_v52 = vpop.f32.mrf.mxu1 }
 0xa5c   :  { %v2478_v8 = vpop.eup %2477 }
 0xa5d   :  { %v1345_v6 = vadd.f32 1.0, %v2478_v8 }
 0xa5f   :  { %2479 = vrcp.f32 %v1345_v6 }
 0xa60   :  { %2481 = vrcp.f32 %v1284_v22 }
 0xa6c   :  { %v2480_v50 = vpop.eup %2479 }
 0xa6d   :  { %1350 = vrot.lane.b32.xlu1 %v2480_v50, %s2627_s11  ;;  %1348 = vrot.lane.b32.xlu0 %v2480_v50, %s2620_s21  ;;  %v2482_v58 = vpop.eup %2481 }
 0xa71   :  { %1289 = vrot.lane.b32.xlu1 %v2482_v58, %s2627_s11  ;;  %1287 = vrot.lane.b32.xlu0 %v2482_v58, %s2620_s21 }
 0xadf   :  { %v1349_v57 = vpop.permute.xlu0 %1348  ;;  %v1351_v43 = vpop.permute.xlu1 %1350 }
 0xae0   :  { %v1353_v20 = vmul.f32 %v1352_v53, %v1349_v57 }
 0xae2   :  { %v1354_v19 = vadd.f32 %v1353_v20, %v278_v36 }
 0xae3   :  { %v1288_v37 = vpop.permute.xlu0 %1287  ;;  %v1290_v62 = vpop.permute.xlu1 %1289 }
 0xae4   :  { %2483 = vtanh.f32 %v1354_v19  ;;  %v1292_v1 = vmul.f32 %v1291_v3, %v1288_v37 }
 0xae6   :  { %v1293_v5 = vadd.f32 %v1292_v1, %v1235_v35 }
 0xae8   :  { %2485 = vtanh.f32 %v1293_v5 }
 0xaf1   :  { %v2484_v41 = vpop.eup %2483 }
 0xaf2   :  { %v1356_v44 = vsub.f32 %v3156_v0, %v2484_v41 }
 0xaf4   :  { %v1357_v55 = vmul.f32 %v1356_v44, %v1351_v43 }
 0xaf5   :  { %v2486_v23 = vpop.eup %2485 }
 0xaf6   :  { %v3284_v24 = vadd.f32 %v2484_v41, %v1357_v55  ;;  %v1295_v25 = vsub.f32 %v3161_v63, %v2486_v23 }
 0xaf8   :  { %v1359_v54 = vpack.c.bf16 %v3284_v24, %v3284_v24  ;;  %v1296_v36 = vmul.f32 %v1295_v25, %v1290_v62 }
 0xafa   :  { %2283 = vmatmul.mubr.bf16.vlgmr.msra.gmra.mxu0 %v1359_v54  ;;  %v3289_v13 = vadd.f32 %v2486_v23, %v1296_v36 }
 0xafb   :  { %2307 = vmatpush3.bf16.msra.mxu0 %v3163_v51  ;;  %2322 = vmatprep.mubr.msk.bf16.mxu0 %vm2628_vm0, %v2626_v16 }
 0xafc   :  { %2308 = vmatprep.subr.bf16.mxu0 %v2626_v16  ;;  %v1298_v0 = vpack.c.bf16 %v3289_v13, %v3289_v13  ;;  %1300 = vst [vmem:[#allocation8 + $0x28] sm:$0xff] %v3289_v13 }
 0xafe   :  { %2303 = vmatmul.mubr.bf16.vlgmr.msra.gmra.mxu1 %v1298_v0 }
 0xaff   :  { %2309 = vmatpush3.bf16.msra.mxu0 %v3172_v47  ;;  %2327 = vmatpush3.bf16.msra.mxu1 %v3083_v2 }
 0xb00   :  { %2310 = vmatprep.subr.bf16.mxu0 %v2626_v16  ;;  %2328 = vmatprep.subr.bf16.mxu1 %v2626_v16 }
 0xb01   :  { %2342 = vmatprep.mubr.msk.bf16.mxu1 %vm2628_vm0, %v2626_v16 }
 0xb03   :  { %2311 = vmatpush3.bf16.msra.mxu0 %v3180_v14  ;;  %2329 = vmatpush3.bf16.msra.mxu1 %v3091_v15 }
 0xb04   :  { %2312 = vmatprep.subr.bf16.mxu0 %v2626_v16  ;;  %2330 = vmatprep.subr.bf16.mxu1 %v2626_v16 }
 0xb07   :  { %2313 = vmatpush3.bf16.msra.mxu0 %v3186_v17  ;;  %2331 = vmatpush3.bf16.msra.mxu1 %v3189_v49 }
 0xb08   :  { %2314 = vmatprep.subr.bf16.mxu0 %v2626_v16  ;;  %2332 = vmatprep.subr.bf16.mxu1 %v2626_v16 }
 0xb0b   :  { %2315 = vmatpush3.bf16.msra.mxu0 %v3194_v9  ;;  %2333 = vmatpush3.bf16.msra.mxu1 %v3197_v10 }
 0xb0c   :  { %2316 = vmatprep.subr.bf16.mxu0 %v2626_v16  ;;  %2334 = vmatprep.subr.bf16.mxu1 %v2626_v16 }
 0xb0f   :  { %2317 = vmatpush3.bf16.msra.mxu0 %v3202_v45  ;;  %2335 = vmatpush3.bf16.msra.mxu1 %v3205_v11 }
 0xb10   :  { %2318 = vmatprep.subr.bf16.mxu0 %v2626_v16  ;;  %2336 = vmatprep.subr.bf16.mxu1 %v2626_v16 }
 0xb13   :  { %2319 = vmatpush3.bf16.msra.mxu0 %v3210_v4  ;;  %2337 = vmatpush3.bf16.msra.mxu1 %v3213_v12 }
 0xb14   :  { %2320 = vmatprep.subr.bf16.mxu0 %v2626_v16  ;;  %2338 = vmatprep.subr.bf16.mxu1 %v2626_v16 }
 0xb17   :  { %2321 = vmatpush3.bf16.msra.mxu0 %v3218_v21  ;;  %2339 = vmatpush3.bf16.msra.mxu1 %v3221_v7 }
 0xb18   :  { %2346 = vmatprep.subr.bf16.mxu0 %v2626_v16  ;;  %2340 = vmatprep.subr.bf16.mxu1 %v2626_v16 }
 0xb1a   :  { %2323 = vmatmul.mubr.bf16.vlgmr.msra.gmra.mxu0 %v1359_v54 }
 0xb1b   :  { %2347 = vmatpush3.bf16.msra.mxu0 %v3226_v18  ;;  %2362 = vmatprep.mubr.msk.bf16.mxu0 %vm2628_vm0, %v2626_v16 }
 0xb1c   :  { %2348 = vmatprep.subr.bf16.mxu0 %v2626_v16  ;;  %2341 = vmatpush3.bf16.msra.mxu1 %v3229_v26 }
 0xb1f   :  { %2349 = vmatpush3.bf16.msra.mxu0 %v3236_v27 }
 0xb20   :  { %2350 = vmatprep.subr.bf16.mxu0 %v2626_v16 }
 0xb23   :  { %2351 = vmatpush3.bf16.msra.mxu0 %v3240_v28 }
 0xb24   :  { %2352 = vmatprep.subr.bf16.mxu0 %v2626_v16 }
 0xb27   :  { %2353 = vmatpush3.bf16.msra.mxu0 %v3244_v29 }
 0xb28   :  { %2354 = vmatprep.subr.bf16.mxu0 %v2626_v16 }
 0xb2b   :  { %2355 = vmatpush3.bf16.msra.mxu0 %v3248_v33 }
 0xb2c   :  { %2356 = vmatprep.subr.bf16.mxu0 %v2626_v16 }
 0xb2f   :  { %2357 = vmatpush3.bf16.msra.mxu0 %v3252_v34 }
 0xb30   :  { %2358 = vmatprep.subr.bf16.mxu0 %v2626_v16 }
 0xb33   :  { %2359 = vmatpush3.bf16.msra.mxu0 %v3256_v38 }
 0xb34   :  { %2360 = vmatprep.subr.bf16.mxu0 %v2626_v16  ;;  %v281_v16 = vadd.f32 %v3140_v42, %v2800_v60 }
 0xb37   :  { %2361 = vmatpush3.bf16.msra.mxu0 %v3260_v39 }
 0xbba   :  { %v1394_v2 = vpop.f32.mrf.mxu0 }
 0xbbb   :  { %v1395_v63 = vadd.f32 %v3267_v31, %v1394_v2 }
 0xbbc   :  { %v2284_v15 = vpop.f32.mrf.mxu0 }
 0xbbe   :  { %v1397_v51 = vpop.f32.mrf.mxu0  ;;  %v1434_v47 = vpop.f32.mrf.mxu1 }
 0xbbf   :  { %v1440_v14 = vadd.f32 %v1434_v47, %v1395_v63  ;;  %v1451_v60 = vadd.f32 %v3280_v59, %v1434_v47 }
 0xbc0   :  { %v2285_v17 = vpop.f32.mrf.mxu0  ;;  %v2304_v49 = vpop.f32.mrf.mxu1 }
 0xbc1   :  { %v1689_v9 = vmul.f32 -1.442695, %v1440_v14 }
 0xbc2   :  { %v1437_v10 = vpop.f32.mrf.mxu1 }
 0xbc3   :  { %2487 = vpow2.f32 %v1689_v9 }
 0xbc4   :  { %v2305_v45 = vpop.f32.mrf.mxu1 }
 0xbd0   :  { %v2488_v11 = vpop.eup %2487 }
 0xbd1   :  { %v1444_v4 = vadd.f32 1.0, %v2488_v11 }
 0xbd3   :  { %2489 = vrcp.f32 %v1444_v4 }
 0xbda   :  { %v1495_v12 = vpop.f32.mrf.mxu0 }
 0xbdb   :  { %v1501_v21 = vadd.f32 %v1495_v12, %v281_v16  ;;  %v1512_v52 = vadd.f32 %v3151_v40, %v1495_v12 }
 0xbdc   :  { %v2324_v7 = vpop.f32.mrf.mxu0 }
 0xbdd   :  { %v1690_v18 = vmul.f32 -1.442695, %v1501_v21 }
 0xbde   :  { %v1498_v26 = vpop.f32.mrf.mxu0 }
 0xbdf   :  { %2491 = vpow2.f32 %v1690_v18 }
 0xbe0   :  { %v2490_v27 = vpop.eup %2489  ;;  %v2325_v28 = vpop.f32.mrf.mxu0 }
 0xbe1   :  { %1447 = vrot.lane.b32.xlu1 %v2490_v27, %s2620_s21 }
 0xbe5   :  { %1449 = vrot.lane.b32.xlu1 %v2490_v27, %s2627_s11 }
 0xbec   :  { %v2492_v29 = vpop.eup %2491 }
 0xbed   :  { %v1505_v33 = vadd.f32 1.0, %v2492_v29 }
 0xbef   :  { %2493 = vrcp.f32 %v1505_v33 }
 0xbfc   :  { %v2494_v34 = vpop.eup %2493 }
 0xbfd   :  { %1508 = vrot.lane.b32.xlu0 %v2494_v34, %s2620_s21 }
 0xc01   :  { %1510 = vrot.lane.b32.xlu0 %v2494_v34, %s2627_s11 }
 0xc53   :  { %v1448_v42 = vpop.permute.xlu1 %1447 }
 0xc54   :  { %v1452_v38 = vmul.f32 %v1451_v60, %v1448_v42 }
 0xc56   :  { %v1453_v39 = vadd.f32 %v1452_v38, %v1395_v63 }
 0xc57   :  { %v1450_v61 = vpop.permute.xlu1 %1449 }
 0xc58   :  { %2495 = vtanh.f32 %v1453_v39 }
 0xc65   :  { %v2496_v35 = vpop.eup %2495 }
 0xc66   :  { %v1455_v30 = vsub.f32 %v3289_v13, %v2496_v35 }
 0xc68   :  { %v1456_v56 = vmul.f32 %v1455_v30, %v1450_v61 }
 0xc6a   :  { %v1457_v46 = vadd.f32 %v2496_v35, %v1456_v56 }
 0xc6c   :  { %v1458_v48 = vpack.c.bf16 %v1457_v46, %v1457_v46  ;;  %1460 = vst [vmem:[#allocation8 + $0x30] sm:$0xff] %v1457_v46 }
 0xc6e   :  { %2363 = vmatmul.mubr.bf16.vlgmr.msra.gmra.mxu0 %v1458_v48 }
 0xc6f   :  { %v1509_v32 = vpop.permute.xlu0 %1508 }
 0xc70   :  { %v1513_v8 = vmul.f32 %v1512_v52, %v1509_v32 }
 0xc72   :  { %v1514_v6 = vadd.f32 %v1513_v8, %v281_v16 }
 0xc73   :  { %v1511_v58 = vpop.permute.xlu0 %1510 }
 0xc74   :  { %2497 = vtanh.f32 %v1514_v6 }
 0xc81   :  { %v2498_v22 = vpop.eup %2497 }
 0xc82   :  { %v1516_v50 = vsub.f32 %v3284_v24, %v2498_v22 }
 0xc84   :  { %v1517_v53 = vmul.f32 %v1516_v50, %v1511_v58 }
 0xc86   :  { %v1518_v57 = vadd.f32 %v2498_v22, %v1517_v53 }
 0xc88   :  { %v1519_v20 = vpack.c.bf16 %v1518_v57, %v1518_v57 }
 0xc8a   :  { %2343 = vmatmul.mubr.bf16.vlgmr.msra.gmra.mxu1 %v1519_v20 }
 0xd2e   :  { %v1594_v3 = vpop.f32.mrf.mxu0 }
 0xd2f   :  { %v1611_v54 = vadd.f32 %v3280_v59, %v1594_v3 }
 0xd30   :  { %v2364_v19 = vpop.f32.mrf.mxu0 }
 0xd32   :  { %v1597_v37 = vpop.f32.mrf.mxu0 }
 0xd34   :  { %v2365_v1 = vpop.f32.mrf.mxu0 }
 0xd4a   :  { %v1554_v5 = vpop.f32.mrf.mxu1 }
 0xd4b   :  { %v1555_v40 = vadd.f32 %v3267_v31, %v1554_v5 }
 0xd4c   :  { %v2344_v41 = vpop.f32.mrf.mxu1 }
 0xd4d   :  { %v1600_v43 = vadd.f32 %v1594_v3, %v1555_v40 }
 0xd4e   :  { %v1557_v44 = vpop.f32.mrf.mxu1 }
 0xd4f   :  { %v1691_v55 = vmul.f32 -1.442695, %v1600_v43 }
 0xd50   :  { %v2345_v23 = vpop.f32.mrf.mxu1 }
 0xd51   :  { %2499 = vpow2.f32 %v1691_v55 }
 0xd5e   :  { %v2500_v25 = vpop.eup %2499 }
 0xd5f   :  { %v1604_v24 = vadd.f32 1.0, %v2500_v25 }
 0xd61   :  { %2501 = vrcp.f32 %v1604_v24 }
 0xd6e   :  { %v2502_v62 = vpop.eup %2501 }
 0xd6f   :  { %1609 = vrot.lane.b32.xlu1 %v2502_v62, %s2627_s11  ;;  %1607 = vrot.lane.b32.xlu0 %v2502_v62, %s2620_s21 }
 0xde1   :  { %v1608_v36 = vpop.permute.xlu0 %1607  ;;  %v1610_v15 = vpop.permute.xlu1 %1609 }
 0xde2   :  { %v1612_v13 = vmul.f32 %v1611_v54, %v1608_v36 }
 0xde4   :  { %v1613_v0 = vadd.f32 %v1612_v13, %v1555_v40 }
 0xde6   :  { %2503 = vtanh.f32 %v1613_v0 }
 0xdf3   :  { %v2504_v31 = vpop.eup %2503 }
 0xdf4   :  { %v1615_v2 = vsub.f32 %v1457_v46, %v2504_v31 }
 0xdf6   :  { %v1616_v63 = vmul.f32 %v1615_v2, %v1610_v15 }
 0xdf8   :  { %v1617_v51 = vadd.f32 %v2504_v31, %v1616_v63 }
 0xdfa   :  { %1619 = vst [vmem:[#allocation8 + $0x38] sm:$0xff] %v1617_v51 }
 0xdfb   :  { %2604 = shalt.err (!%p2601_p5)
}
 0xdfc   :  { %1631 = dma.vmem_to_hbm [thread:$0]  %s1626_s26, 1024, %s3372_s5, [#allocation4], %s2623_s28, %s2623_s28, %s2624_s29  }
 0xdfd   :  { %2617 = dma.done.wait [#allocation4], 1024  }
 0xdfe   :  { %2618 = vsyncadd [#allocation4], 4294966272 }
 0xdff   :  { %1635 = vsyncpa [#allocation3], 1 }
 0xe00   :  { %1636 = vsyncpa [#allocation6], 1 }
 0xe01   :  { %1637 = vsyncpa [#allocation4], 1 }

</bundles_post_ra>
